<compile_context>
chip_gen: v5e
topology: v5e:2x2
jax: 0.10.0
libtpu: 0.0.40
codegen_flags: <defaults>
</compile_context>

<pallas_src>
import functools
import math

import jax
import jax.numpy as jnp
from jax.experimental import pallas as pl
from jax.experimental.pallas import tpu as pltpu


# ----------------------------------------------------------------------------
# shared math helpers (used both inside the kernel and in the JAX reference)
# ----------------------------------------------------------------------------
def _layernorm(x, g, b, eps=1e-5):
    mu = jnp.mean(x, axis=-1, keepdims=True)
    var = jnp.mean(jnp.square(x - mu), axis=-1, keepdims=True)
    return (x - mu) * jax.lax.rsqrt(var + eps) * g + b


def _gelu(x):
    # TODO(synk): PyTorch F.gelu defaults to the exact erf-based GELU; erf is
    # not reliably lowerable in Mosaic, so the tanh approximation is used in
    # BOTH the kernel and the reference (max deviation ~1e-3).
    c = 0.7978845608028654  # sqrt(2/pi)
    return 0.5 * x * (1.0 + jnp.tanh(c * (x + 0.044715 * x * x * x)))


# ----------------------------------------------------------------------------
# fused transformer sub-block kernel:
#   out = FF(LN2(y)) + LN2(y),  y = Attn(LN1(x)) + LN1(x)
# ----------------------------------------------------------------------------
def _fused_block_kernel(x_ref, ln1_g_ref, ln1_b_ref, wqkv_ref, wo_ref, bo_ref,
                        ln2_g_ref, ln2_b_ref, w1_ref, b1_ref, w2_ref, b2_ref,
                        o_ref, *, heads, dim_head, scale):
    x = x_ref[0]                                                   # (n, dim)

    # ---- PreNorm 1 ----
    ln1 = _layernorm(x, ln1_g_ref[...], ln1_b_ref[...])

    # ---- multi-head self-attention (MXU, f32 accumulate) ----
    inner = heads * dim_head
    qkv = jnp.dot(ln1, wqkv_ref[...], preferred_element_type=jnp.float32)  # (n, 3*inner)
    attn_out = None
    for h in range(heads):                                         # static unroll
        lo = h * dim_head
        q_h = qkv[:, lo:lo + dim_head]
        k_h = qkv[:, inner + lo:inner + lo + dim_head]
        v_h = qkv[:, 2 * inner + lo:2 * inner + lo + dim_head]
        sim = jax.lax.dot_general(q_h, k_h, (((1,), (1,)), ((), ())),
                                  preferred_element_type=jnp.float32) * scale
        sim = sim - jnp.max(sim, axis=-1, keepdims=True)
        e = jnp.exp(sim)
        attn = e / jnp.sum(e, axis=-1, keepdims=True)
        head_out = jnp.dot(attn, v_h, preferred_element_type=jnp.float32)  # (n, dh)
        # fold each head straight into the output projection: sum_h o_h @ Wo[h]
        contrib = jnp.dot(head_out, wo_ref[lo:lo + dim_head, :],
                          preferred_element_type=jnp.float32)              # (n, dim)
        attn_out = contrib if attn_out is None else attn_out + contrib
    y = attn_out + bo_ref[...] + ln1        # Residual adds the *normalized* x

    # ---- PreNorm 2 + GEGLU feed-forward ----
    ln2 = _layernorm(y, ln2_g_ref[...], ln2_b_ref[...])
    h1 = jnp.dot(ln2, w1_ref[...], preferred_element_type=jnp.float32) + b1_ref[...]
    half = h1.shape[-1] // 2
    gated = h1[:, :half] * _gelu(h1[:, half:])
    ff = jnp.dot(gated, w2_ref[...], preferred_element_type=jnp.float32) + b2_ref[...]
    o_ref[0] = (ff + ln2).astype(o_ref.dtype)


def fused_block(x, p, *, heads, dim_head):
    """x: (b, n, dim). One fused PreNorm+Attn+Res+PreNorm+GEGLU-FF+Res block."""
    b, n, d = x.shape
    inner = heads * dim_head
    assert p["wo"].shape[0] == inner
    hidden2 = p["w1"].shape[1]          # 2 * mult * dim
    hidden = p["w2"].shape[0]           # mult * dim

    kern = functools.partial(_fused_block_kernel, heads=heads, dim_head=dim_head,
                             scale=float(dim_head) ** -0.5)
    const = lambda i: (0, 0)            # weights: same block every grid step
    return pl.pallas_call(
        kern,
        out_shape=jax.ShapeDtypeStruct((b, n, d), x.dtype),
        grid=(b,),
        in_specs=[
            pl.BlockSpec((1, n, d), lambda i: (i, 0, 0)),   # x (one batch row)
            pl.BlockSpec((1, d), const),                    # ln1 gamma
            pl.BlockSpec((1, d), const),                    # ln1 beta
            pl.BlockSpec((d, 3 * inner), const),            # Wqkv (in, out)
            pl.BlockSpec((inner, d), const),                # Wo   (in, out)
            pl.BlockSpec((1, d), const),                    # bo
            pl.BlockSpec((1, d), const),                    # ln2 gamma
            pl.BlockSpec((1, d), const),                    # ln2 beta
            pl.BlockSpec((d, hidden2), const),              # W1   (in, out)
            pl.BlockSpec((1, hidden2), const),              # b1
            pl.BlockSpec((hidden, d), const),               # W2   (in, out)
            pl.BlockSpec((1, d), const),                    # b2
        ],
        out_specs=pl.BlockSpec((1, n, d), lambda i: (i, 0, 0)),
        compiler_params=pltpu.CompilerParams(dimension_semantics=("parallel",)),
    )(x, p["ln1_g"], p["ln1_b"], p["wqkv"], p["wo"], p["bo"],
      p["ln2_g"], p["ln2_b"], p["w1"], p["b1"], p["w2"], p["b2"])


# ----------------------------------------------------------------------------
# parameter init (mimics nn.Linear / nn.LayerNorm defaults); weights stored
# pre-transposed as (in, out) so the kernel never transposes.
# ----------------------------------------------------------------------------
def _init_linear(key, d_in, d_out, bias=True):
    kw, kb = jax.random.split(key)
    bound = 1.0 / math.sqrt(d_in)
    w = jax.random.uniform(kw, (d_in, d_out), jnp.float32, -bound, bound)
    b = jax.random.uniform(kb, (1, d_out), jnp.float32, -bound, bound) if bias else None
    return w, b


def init_block_params(key, dim, heads, dim_head, mult=4):
    inner = heads * dim_head
    k0, k1, k2, k3 = jax.random.split(key, 4)
    wqkv, _ = _init_linear(k0, dim, 3 * inner, bias=False)
    wo, bo = _init_linear(k1, inner, dim)
    w1, b1 = _init_linear(k2, dim, dim * mult * 2)
    w2, b2 = _init_linear(k3, dim * mult, dim)
    return dict(ln1_g=jnp.ones((1, dim), jnp.float32), ln1_b=jnp.zeros((1, dim), jnp.float32),
                wqkv=wqkv, wo=wo, bo=bo,
                ln2_g=jnp.ones((1, dim), jnp.float32), ln2_b=jnp.zeros((1, dim), jnp.float32),
                w1=w1, b1=b1, w2=w2, b2=b2)


def init_rowcol_params(key, dim, nfeats, depth, heads, dim_head, style):
    layers = []
    for _ in range(depth):
        key, k1, k2 = jax.random.split(key, 3)
        if style == "colrow":
            layers.append(dict(col=init_block_params(k1, dim, heads, dim_head),
                               row=init_block_params(k2, dim * nfeats, heads, 64)))
        else:
            layers.append(dict(row=init_block_params(k1, dim * nfeats, heads, 64)))
    return layers


# ----------------------------------------------------------------------------
# forward pass (Pallas)
# ----------------------------------------------------------------------------
def rowcol_forward(x, params, x_cont=None, *, style, heads, dim_head):
    if x_cont is not None:
        x = jnp.concatenate([x, x_cont], axis=1)
    b, n, d = x.shape
    for layer in params:
        if style == "colrow":
            x = fused_block(x, layer["col"], heads=heads, dim_head=dim_head)
        xr = x.reshape(1, b, n * d)                 # 'b n d -> 1 b (n d)'
        xr = fused_block(xr, layer["row"], heads=heads, dim_head=64)
        x = xr.reshape(b, n, d)                     # '1 b (n d) -> b n d'
    return x


# ----------------------------------------------------------------------------
# plain-JAX reference (high-precision matmuls) for validation
# ----------------------------------------------------------------------------
_mm = functools.partial(jnp.matmul, precision=jax.lax.Precision.HIGHEST)


def _attention_ref(x, p, heads, dim_head):
    b, n, _ = x.shape
    inner = heads * dim_head
    qkv = _mm(x, p["wqkv"])
    q, k, v = qkv[..., :inner], qkv[..., inner:2 * inner], qkv[..., 2 * inner:]
    sh = lambda t: t.reshape(b, n, heads, dim_head).transpose(0, 2, 1, 3)
    q, k, v = sh(q), sh(k), sh(v)
    sim = jnp.einsum("bhid,bhjd->bhij", q, k,
                     precision=jax.lax.Precision.HIGHEST) * (float(dim_head) ** -0.5)
    attn = jax.nn.softmax(sim, axis=-1)
    out = jnp.einsum("bhij,bhjd->bhid", attn, v, precision=jax.lax.Precision.HIGHEST)
    out = out.transpose(0, 2, 1, 3).reshape(b, n, inner)
    return _mm(out, p["wo"]) + p["bo"]


def _ff_ref(x, p):
    h = _mm(x, p["w1"]) + p["b1"]
    half = h.shape[-1] // 2
    h = h[..., :half] * _gelu(h[..., half:])
    return _mm(h, p["w2"]) + p["b2"]


def _block_ref(x, p, heads, dim_head):
    ln1 = _layernorm(x, p["ln1_g"], p["ln1_b"])
    y = _attention_ref(ln1, p, heads, dim_head) + ln1
    ln2 = _layernorm(y, p["ln2_g"], p["ln2_b"])
    return _ff_ref(ln2, p) + ln2


def rowcol_reference(x, params, x_cont=None, *, style, heads, dim_head):
    if x_cont is not None:
        x = jnp.concatenate([x, x_cont], axis=1)
    b, n, d = x.shape
    for layer in params:
        if style == "colrow":
            x = _block_ref(x, layer["col"], heads, dim_head)
        x = _block_ref(x.reshape(1, b, n * d), layer["row"], heads, 64).reshape(b, n, d)
    return x


# ----------------------------------------------------------------------------
if __name__ == "__main__":
    key = jax.random.PRNGKey(0)
    # Small SAINT-like config: RowColTransformer(num_tokens, dim=8, nfeats=4,
    # depth=2, heads=2, dim_head=8, attn_dropout=0, ff_dropout=0, style=...)
    dim, nfeats, depth, heads, dim_head = 8, 4, 2, 2, 8
    batch, n_cat, n_cont = 2, 3, 1          # n_cat + n_cont == nfeats

    kx, kc, kp_cr, kp_c = jax.random.split(key, 4)
    x = jax.random.normal(kx, (batch, n_cat, dim), jnp.float32)
    x_cont = jax.random.normal(kc, (batch, n_cont, dim), jnp.float32)

    for style, kp in (("colrow", kp_cr), ("col", kp_c)):
        params = init_rowcol_params(kp, dim, nfeats, depth, heads, dim_head, style)
        fwd = jax.jit(functools.partial(rowcol_forward, style=style,
                                        heads=heads, dim_head=dim_head))
        out = jax.block_until_ready(fwd(x, params, x_cont))
        ref = rowcol_reference(x, params, x_cont, style=style,
                               heads=heads, dim_head=dim_head)
        assert out.shape == (batch, nfeats, dim)
        # tolerance covers MXU pass-precision differences vs the HIGHEST-precision
        # reference; a real bug produces O(0.1-1) errors.
        assert jnp.allclose(out, ref, atol=1e-2, rtol=1e-2), f"mismatch ({style})"

    print("KERNEL_OK")
</pallas_src>

<mosaic_0001>
module attributes {stable_mosaic.version = 11 : i64} {
  func.func @_fused_block_kernel(%arg0: i32, %arg1: memref<1x4x8xf32, #tpu.memory_space<vmem>>, %arg2: memref<1x8xf32, #tpu.memory_space<vmem>>, %arg3: memref<1x8xf32, #tpu.memory_space<vmem>>, %arg4: memref<8x48xf32, #tpu.memory_space<vmem>>, %arg5: memref<16x8xf32, #tpu.memory_space<vmem>>, %arg6: memref<1x8xf32, #tpu.memory_space<vmem>>, %arg7: memref<1x8xf32, #tpu.memory_space<vmem>>, %arg8: memref<1x8xf32, #tpu.memory_space<vmem>>, %arg9: memref<8x64xf32, #tpu.memory_space<vmem>>, %arg10: memref<1x64xf32, #tpu.memory_space<vmem>>, %arg11: memref<32x8xf32, #tpu.memory_space<vmem>>, %arg12: memref<1x8xf32, #tpu.memory_space<vmem>>, %arg13: memref<1x4x8xf32, #tpu.memory_space<vmem>>) attributes {dimension_semantics = [#tpu.dimension_semantics<parallel>], iteration_bounds = array<i64: 2>, scalar_prefetch = 0 : i64, scratch_operands = 0 : i64, tpu.core_type = #tpu.core_type<tc>, window_params = [{transform_indices = @transform_0, window_bounds = array<i64: 1, 4, 8>}, {pipeline_mode = #tpu.pipeline_mode<synchronous>, transform_indices = @transform_1, window_bounds = array<i64: 1, 8>}, {pipeline_mode = #tpu.pipeline_mode<synchronous>, transform_indices = @transform_2, window_bounds = array<i64: 1, 8>}, {pipeline_mode = #tpu.pipeline_mode<synchronous>, transform_indices = @transform_3, window_bounds = array<i64: 8, 48>}, {pipeline_mode = #tpu.pipeline_mode<synchronous>, transform_indices = @transform_4, window_bounds = array<i64: 16, 8>}, {pipeline_mode = #tpu.pipeline_mode<synchronous>, transform_indices = @transform_5, window_bounds = array<i64: 1, 8>}, {pipeline_mode = #tpu.pipeline_mode<synchronous>, transform_indices = @transform_6, window_bounds = array<i64: 1, 8>}, {pipeline_mode = #tpu.pipeline_mode<synchronous>, transform_indices = @transform_7, window_bounds = array<i64: 1, 8>}, {pipeline_mode = #tpu.pipeline_mode<synchronous>, transform_indices = @transform_8, window_bounds = array<i64: 8, 64>}, {pipeline_mode = #tpu.pipeline_mode<synchronous>, transform_indices = @transform_9, window_bounds = array<i64: 1, 64>}, {pipeline_mode = #tpu.pipeline_mode<synchronous>, transform_indices = @transform_10, window_bounds = array<i64: 32, 8>}, {pipeline_mode = #tpu.pipeline_mode<synchronous>, transform_indices = @transform_11, window_bounds = array<i64: 1, 8>}, {transform_indices = @transform_12, window_bounds = array<i64: 1, 4, 8>}]} {
    %c0 = arith.constant 0 : index
    %c0_0 = arith.constant 0 : index
    %c0_1 = arith.constant 0 : index
    %0 = vector.load %arg1[%c0, %c0_0, %c0_1] : memref<1x4x8xf32, #tpu.memory_space<vmem>>, vector<1x4x8xf32>
    %1 = vector.shape_cast %0 : vector<1x4x8xf32> to vector<4x8xf32>
    %c0_2 = arith.constant 0 : index
    %c0_3 = arith.constant 0 : index
    %2 = vector.load %arg2[%c0_2, %c0_3] : memref<1x8xf32, #tpu.memory_space<vmem>>, vector<1x8xf32>
    %c0_4 = arith.constant 0 : index
    %c0_5 = arith.constant 0 : index
    %3 = vector.load %arg3[%c0_4, %c0_5] : memref<1x8xf32, #tpu.memory_space<vmem>>, vector<1x8xf32>
    %cst = arith.constant dense<0.000000e+00> : vector<4xf32>
    %4 = vector.multi_reduction <add>, %1, %cst [1] : vector<4x8xf32> to vector<4xf32>
    %5 = vector.shape_cast %4 : vector<4xf32> to vector<4x1xf32>
    %cst_6 = arith.constant 8.000000e+00 : f32
    %6 = vector.broadcast %cst_6 : f32 to vector<4x1xf32>
    %7 = arith.divf %5, %6 : vector<4x1xf32>
    %8 = vector.broadcast %7 : vector<4x1xf32> to vector<4x8xf32>
    %9 = arith.subf %1, %8 : vector<4x8xf32>
    %10 = arith.mulf %9, %9 : vector<4x8xf32>
    %cst_7 = arith.constant dense<0.000000e+00> : vector<4xf32>
    %11 = vector.multi_reduction <add>, %10, %cst_7 [1] : vector<4x8xf32> to vector<4xf32>
    %12 = vector.shape_cast %11 : vector<4xf32> to vector<4x1xf32>
    %cst_8 = arith.constant 8.000000e+00 : f32
    %13 = vector.broadcast %cst_8 : f32 to vector<4x1xf32>
    %14 = arith.divf %12, %13 : vector<4x1xf32>
    %15 = vector.broadcast %7 : vector<4x1xf32> to vector<4x8xf32>
    %16 = arith.subf %1, %15 : vector<4x8xf32>
    %cst_9 = arith.constant 9.99999974E-6 : f32
    %17 = vector.broadcast %cst_9 : f32 to vector<4x1xf32>
    %18 = arith.addf %14, %17 : vector<4x1xf32>
    %19 = math.rsqrt %18 : vector<4x1xf32>
    %20 = vector.broadcast %19 : vector<4x1xf32> to vector<4x8xf32>
    %21 = arith.mulf %16, %20 : vector<4x8xf32>
    %22 = vector.broadcast %2 : vector<1x8xf32> to vector<4x8xf32>
    %23 = arith.mulf %21, %22 : vector<4x8xf32>
    %24 = vector.broadcast %3 : vector<1x8xf32> to vector<4x8xf32>
    %25 = arith.addf %23, %24 : vector<4x8xf32>
    %c0_10 = arith.constant 0 : index
    %c0_11 = arith.constant 0 : index
    %26 = vector.load %arg4[%c0_10, %c0_11] : memref<8x48xf32, #tpu.memory_space<vmem>>, vector<8x48xf32>
    %cst_12 = arith.constant dense<0.000000e+00> : vector<4x48xf32>
    %27 = tpu.matmul %25, %26, %cst_12 {dimension_numbers = #tpu.dot_dimension_numbers<[1], [0], [0], [1], [0, 0, 1, 1], [], []>} : vector<4x8xf32>, vector<8x48xf32>, vector<4x48xf32> -> vector<4x48xf32>
    %28 = vector.extract_strided_slice %27 {offsets = [0, 0], sizes = [4, 8], strides = [1, 1]} : vector<4x48xf32> to vector<4x8xf32>
    %29 = vector.extract_strided_slice %27 {offsets = [0, 16], sizes = [4, 8], strides = [1, 1]} : vector<4x48xf32> to vector<4x8xf32>
    %30 = vector.extract_strided_slice %27 {offsets = [0, 32], sizes = [4, 8], strides = [1, 1]} : vector<4x48xf32> to vector<4x8xf32>
    %cst_13 = arith.constant dense<0.000000e+00> : vector<4x4xf32>
    %31 = tpu.matmul %28, %29, %cst_13 {dimension_numbers = #tpu.dot_dimension_numbers<[1], [1], [0], [0], [0, 0, 1, 0], [], []>} : vector<4x8xf32>, vector<4x8xf32>, vector<4x4xf32> -> vector<4x4xf32>
    %cst_14 = arith.constant 0.353553385 : f32
    %32 = vector.broadcast %cst_14 : f32 to vector<4x4xf32>
    %33 = arith.mulf %31, %32 : vector<4x4xf32>
    %cst_15 = arith.constant dense<0xFF800000> : vector<4xf32>
    %34 = vector.multi_reduction <maximumf>, %33, %cst_15 [1] : vector<4x4xf32> to vector<4xf32>
    %35 = vector.shape_cast %34 : vector<4xf32> to vector<4x1xf32>
    %36 = vector.broadcast %35 : vector<4x1xf32> to vector<4x4xf32>
    %37 = arith.subf %33, %36 : vector<4x4xf32>
    %38 = math.exp %37 : vector<4x4xf32>
    %cst_16 = arith.constant dense<0.000000e+00> : vector<4xf32>
    %39 = vector.multi_reduction <add>, %38, %cst_16 [1] : vector<4x4xf32> to vector<4xf32>
    %40 = vector.shape_cast %39 : vector<4xf32> to vector<4x1xf32>
    %41 = vector.broadcast %40 : vector<4x1xf32> to vector<4x4xf32>
    %42 = arith.divf %38, %41 : vector<4x4xf32>
    %cst_17 = arith.constant dense<0.000000e+00> : vector<4x8xf32>
    %43 = tpu.matmul %42, %30, %cst_17 {dimension_numbers = #tpu.dot_dimension_numbers<[1], [0], [0], [1], [0, 0, 1, 1], [], []>} : vector<4x4xf32>, vector<4x8xf32>, vector<4x8xf32> -> vector<4x8xf32>
    %c0_18 = arith.constant 0 : index
    %c0_19 = arith.constant 0 : index
    %44 = vector.load %arg5[%c0_18, %c0_19] : memref<16x8xf32, #tpu.memory_space<vmem>>, vector<8x8xf32>
    %cst_20 = arith.constant dense<0.000000e+00> : vector<4x8xf32>
    %45 = tpu.matmul %43, %44, %cst_20 {dimension_numbers = #tpu.dot_dimension_numbers<[1], [0], [0], [1], [0, 0, 1, 1], [], []>} : vector<4x8xf32>, vector<8x8xf32>, vector<4x8xf32> -> vector<4x8xf32>
    %46 = vector.extract_strided_slice %27 {offsets = [0, 8], sizes = [4, 8], strides = [1, 1]} : vector<4x48xf32> to vector<4x8xf32>
    %47 = vector.extract_strided_slice %27 {offsets = [0, 24], sizes = [4, 8], strides = [1, 1]} : vector<4x48xf32> to vector<4x8xf32>
    %48 = vector.extract_strided_slice %27 {offsets = [0, 40], sizes = [4, 8], strides = [1, 1]} : vector<4x48xf32> to vector<4x8xf32>
    %cst_21 = arith.constant dense<0.000000e+00> : vector<4x4xf32>
    %49 = tpu.matmul %46, %47, %cst_21 {dimension_numbers = #tpu.dot_dimension_numbers<[1], [1], [0], [0], [0, 0, 1, 0], [], []>} : vector<4x8xf32>, vector<4x8xf32>, vector<4x4xf32> -> vector<4x4xf32>
    %cst_22 = arith.constant 0.353553385 : f32
    %50 = vector.broadcast %cst_22 : f32 to vector<4x4xf32>
    %51 = arith.mulf %49, %50 : vector<4x4xf32>
    %cst_23 = arith.constant dense<0xFF800000> : vector<4xf32>
    %52 = vector.multi_reduction <maximumf>, %51, %cst_23 [1] : vector<4x4xf32> to vector<4xf32>
    %53 = vector.shape_cast %52 : vector<4xf32> to vector<4x1xf32>
    %54 = vector.broadcast %53 : vector<4x1xf32> to vector<4x4xf32>
    %55 = arith.subf %51, %54 : vector<4x4xf32>
    %56 = math.exp %55 : vector<4x4xf32>
    %cst_24 = arith.constant dense<0.000000e+00> : vector<4xf32>
    %57 = vector.multi_reduction <add>, %56, %cst_24 [1] : vector<4x4xf32> to vector<4xf32>
    %58 = vector.shape_cast %57 : vector<4xf32> to vector<4x1xf32>
    %59 = vector.broadcast %58 : vector<4x1xf32> to vector<4x4xf32>
    %60 = arith.divf %56, %59 : vector<4x4xf32>
    %cst_25 = arith.constant dense<0.000000e+00> : vector<4x8xf32>
    %61 = tpu.matmul %60, %48, %cst_25 {dimension_numbers = #tpu.dot_dimension_numbers<[1], [0], [0], [1], [0, 0, 1, 1], [], []>} : vector<4x4xf32>, vector<4x8xf32>, vector<4x8xf32> -> vector<4x8xf32>
    %c8 = arith.constant 8 : index
    %c0_26 = arith.constant 0 : index
    %62 = vector.load %arg5[%c8, %c0_26] : memref<16x8xf32, #tpu.memory_space<vmem>>, vector<8x8xf32>
    %cst_27 = arith.constant dense<0.000000e+00> : vector<4x8xf32>
    %63 = tpu.matmul %61, %62, %cst_27 {dimension_numbers = #tpu.dot_dimension_numbers<[1], [0], [0], [1], [0, 0, 1, 1], [], []>} : vector<4x8xf32>, vector<8x8xf32>, vector<4x8xf32> -> vector<4x8xf32>
    %64 = arith.addf %45, %63 : vector<4x8xf32>
    %c0_28 = arith.constant 0 : index
    %c0_29 = arith.constant 0 : index
    %65 = vector.load %arg6[%c0_28, %c0_29] : memref<1x8xf32, #tpu.memory_space<vmem>>, vector<1x8xf32>
    %66 = vector.broadcast %65 : vector<1x8xf32> to vector<4x8xf32>
    %67 = arith.addf %64, %66 : vector<4x8xf32>
    %68 = arith.addf %67, %25 : vector<4x8xf32>
    %c0_30 = arith.constant 0 : index
    %c0_31 = arith.constant 0 : index
    %69 = vector.load %arg7[%c0_30, %c0_31] : memref<1x8xf32, #tpu.memory_space<vmem>>, vector<1x8xf32>
    %c0_32 = arith.constant 0 : index
    %c0_33 = arith.constant 0 : index
    %70 = vector.load %arg8[%c0_32, %c0_33] : memref<1x8xf32, #tpu.memory_space<vmem>>, vector<1x8xf32>
    %cst_34 = arith.constant dense<0.000000e+00> : vector<4xf32>
    %71 = vector.multi_reduction <add>, %68, %cst_34 [1] : vector<4x8xf32> to vector<4xf32>
    %72 = vector.shape_cast %71 : vector<4xf32> to vector<4x1xf32>
    %cst_35 = arith.constant 8.000000e+00 : f32
    %73 = vector.broadcast %cst_35 : f32 to vector<4x1xf32>
    %74 = arith.divf %72, %73 : vector<4x1xf32>
    %75 = vector.broadcast %74 : vector<4x1xf32> to vector<4x8xf32>
    %76 = arith.subf %68, %75 : vector<4x8xf32>
    %77 = arith.mulf %76, %76 : vector<4x8xf32>
    %cst_36 = arith.constant dense<0.000000e+00> : vector<4xf32>
    %78 = vector.multi_reduction <add>, %77, %cst_36 [1] : vector<4x8xf32> to vector<4xf32>
    %79 = vector.shape_cast %78 : vector<4xf32> to vector<4x1xf32>
    %cst_37 = arith.constant 8.000000e+00 : f32
    %80 = vector.broadcast %cst_37 : f32 to vector<4x1xf32>
    %81 = arith.divf %79, %80 : vector<4x1xf32>
    %82 = vector.broadcast %74 : vector<4x1xf32> to vector<4x8xf32>
    %83 = arith.subf %68, %82 : vector<4x8xf32>
    %cst_38 = arith.constant 9.99999974E-6 : f32
    %84 = vector.broadcast %cst_38 : f32 to vector<4x1xf32>
    %85 = arith.addf %81, %84 : vector<4x1xf32>
    %86 = math.rsqrt %85 : vector<4x1xf32>
    %87 = vector.broadcast %86 : vector<4x1xf32> to vector<4x8xf32>
    %88 = arith.mulf %83, %87 : vector<4x8xf32>
    %89 = vector.broadcast %69 : vector<1x8xf32> to vector<4x8xf32>
    %90 = arith.mulf %88, %89 : vector<4x8xf32>
    %91 = vector.broadcast %70 : vector<1x8xf32> to vector<4x8xf32>
    %92 = arith.addf %90, %91 : vector<4x8xf32>
    %c0_39 = arith.constant 0 : index
    %c0_40 = arith.constant 0 : index
    %93 = vector.load %arg9[%c0_39, %c0_40] : memref<8x64xf32, #tpu.memory_space<vmem>>, vector<8x64xf32>
    %cst_41 = arith.constant dense<0.000000e+00> : vector<4x64xf32>
    %94 = tpu.matmul %92, %93, %cst_41 {dimension_numbers = #tpu.dot_dimension_numbers<[1], [0], [0], [1], [0, 0, 1, 1], [], []>} : vector<4x8xf32>, vector<8x64xf32>, vector<4x64xf32> -> vector<4x64xf32>
    %c0_42 = arith.constant 0 : index
    %c0_43 = arith.constant 0 : index
    %95 = vector.load %arg10[%c0_42, %c0_43] : memref<1x64xf32, #tpu.memory_space<vmem>>, vector<1x64xf32>
    %96 = vector.broadcast %95 : vector<1x64xf32> to vector<4x64xf32>
    %97 = arith.addf %94, %96 : vector<4x64xf32>
    %98 = vector.extract_strided_slice %97 {offsets = [0, 0], sizes = [4, 32], strides = [1, 1]} : vector<4x64xf32> to vector<4x32xf32>
    %99 = vector.extract_strided_slice %97 {offsets = [0, 32], sizes = [4, 32], strides = [1, 1]} : vector<4x64xf32> to vector<4x32xf32>
    %cst_44 = arith.constant 5.000000e-01 : f32
    %100 = vector.broadcast %cst_44 : f32 to vector<4x32xf32>
    %101 = arith.mulf %100, %99 : vector<4x32xf32>
    %cst_45 = arith.constant 4.471500e-02 : f32
    %102 = vector.broadcast %cst_45 : f32 to vector<4x32xf32>
    %103 = arith.mulf %102, %99 : vector<4x32xf32>
    %104 = arith.mulf %103, %99 : vector<4x32xf32>
    %105 = arith.mulf %104, %99 : vector<4x32xf32>
    %106 = arith.addf %99, %105 : vector<4x32xf32>
    %cst_46 = arith.constant 0.797884583 : f32
    %107 = vector.broadcast %cst_46 : f32 to vector<4x32xf32>
    %108 = arith.mulf %107, %106 : vector<4x32xf32>
    %109 = math.tanh %108 : vector<4x32xf32>
    %cst_47 = arith.constant 1.000000e+00 : f32
    %110 = vector.broadcast %cst_47 : f32 to vector<4x32xf32>
    %111 = arith.addf %110, %109 : vector<4x32xf32>
    %112 = arith.mulf %101, %111 : vector<4x32xf32>
    %113 = arith.mulf %98, %112 : vector<4x32xf32>
    %c0_48 = arith.constant 0 : index
    %c0_49 = arith.constant 0 : index
    %114 = vector.load %arg11[%c0_48, %c0_49] : memref<32x8xf32, #tpu.memory_space<vmem>>, vector<32x8xf32>
    %cst_50 = arith.constant dense<0.000000e+00> : vector<4x8xf32>
    %115 = tpu.matmul %113, %114, %cst_50 {dimension_numbers = #tpu.dot_dimension_numbers<[1], [0], [0], [1], [0, 0, 1, 1], [], []>} : vector<4x32xf32>, vector<32x8xf32>, vector<4x8xf32> -> vector<4x8xf32>
    %c0_51 = arith.constant 0 : index
    %c0_52 = arith.constant 0 : index
    %116 = vector.load %arg12[%c0_51, %c0_52] : memref<1x8xf32, #tpu.memory_space<vmem>>, vector<1x8xf32>
    %117 = vector.broadcast %116 : vector<1x8xf32> to vector<4x8xf32>
    %118 = arith.addf %115, %117 : vector<4x8xf32>
    %119 = arith.addf %118, %92 : vector<4x8xf32>
    %c0_53 = arith.constant 0 : index
    %c0_54 = arith.constant 0 : index
    %c0_55 = arith.constant 0 : index
    %120 = vector.load %arg13[%c0_53, %c0_54, %c0_55] : memref<1x4x8xf32, #tpu.memory_space<vmem>>, vector<1x4x8xf32>
    %121 = vector.shape_cast %120 : vector<1x4x8xf32> to vector<4x8xf32>
    %122 = vector.shape_cast %119 : vector<4x8xf32> to vector<1x4x8xf32>
    tpu.vector_store %arg13[%c0_53, %c0_54, %c0_55], %122 {strides = array<i32>} : memref<1x4x8xf32, #tpu.memory_space<vmem>>, vector<1x4x8xf32>,
    return
  }
  func.func @transform_0(%arg0: i32) -> (i32, i32, i32) {
    %c0_i32 = arith.constant 0 : i32
    %c0_i32_0 = arith.constant 0 : i32
    %c0_i32_1 = arith.constant 0 : i32
    return %arg0, %c0_i32, %c0_i32_0 : i32, i32, i32
  }
  func.func @transform_1(%arg0: i32) -> (i32, i32) {
    %c0_i32 = arith.constant 0 : i32
    %c0_i32_0 = arith.constant 0 : i32
    %c0_i32_1 = arith.constant 0 : i32
    return %c0_i32, %c0_i32_0 : i32, i32
  }
  func.func @transform_2(%arg0: i32) -> (i32, i32) {
    %c0_i32 = arith.constant 0 : i32
    %c0_i32_0 = arith.constant 0 : i32
    %c0_i32_1 = arith.constant 0 : i32
    return %c0_i32, %c0_i32_0 : i32, i32
  }
  func.func @transform_3(%arg0: i32) -> (i32, i32) {
    %c0_i32 = arith.constant 0 : i32
    %c0_i32_0 = arith.constant 0 : i32
    %c0_i32_1 = arith.constant 0 : i32
    return %c0_i32, %c0_i32_0 : i32, i32
  }
  func.func @transform_4(%arg0: i32) -> (i32, i32) {
    %c0_i32 = arith.constant 0 : i32
    %c0_i32_0 = arith.constant 0 : i32
    %c0_i32_1 = arith.constant 0 : i32
    return %c0_i32, %c0_i32_0 : i32, i32
  }
  func.func @transform_5(%arg0: i32) -> (i32, i32) {
    %c0_i32 = arith.constant 0 : i32
    %c0_i32_0 = arith.constant 0 : i32
    %c0_i32_1 = arith.constant 0 : i32
    return %c0_i32, %c0_i32_0 : i32, i32
  }
  func.func @transform_6(%arg0: i32) -> (i32, i32) {
    %c0_i32 = arith.constant 0 : i32
    %c0_i32_0 = arith.constant 0 : i32
    %c0_i32_1 = arith.constant 0 : i32
    return %c0_i32, %c0_i32_0 : i32, i32
  }
  func.func @transform_7(%arg0: i32) -> (i32, i32) {
    %c0_i32 = arith.constant 0 : i32
    %c0_i32_0 = arith.constant 0 : i32
    %c0_i32_1 = arith.constant 0 : i32
    return %c0_i32, %c0_i32_0 : i32, i32
  }
  func.func @transform_8(%arg0: i32) -> (i32, i32) {
    %c0_i32 = arith.constant 0 : i32
    %c0_i32_0 = arith.constant 0 : i32
    %c0_i32_1 = arith.constant 0 : i32
    return %c0_i32, %c0_i32_0 : i32, i32
  }
  func.func @transform_9(%arg0: i32) -> (i32, i32) {
    %c0_i32 = arith.constant 0 : i32
    %c0_i32_0 = arith.constant 0 : i32
    %c0_i32_1 = arith.constant 0 : i32
    return %c0_i32, %c0_i32_0 : i32, i32
  }
  func.func @transform_10(%arg0: i32) -> (i32, i32) {
    %c0_i32 = arith.constant 0 : i32
    %c0_i32_0 = arith.constant 0 : i32
    %c0_i32_1 = arith.constant 0 : i32
    return %c0_i32, %c0_i32_0 : i32, i32
  }
  func.func @transform_11(%arg0: i32) -> (i32, i32) {
    %c0_i32 = arith.constant 0 : i32
    %c0_i32_0 = arith.constant 0 : i32
    %c0_i32_1 = arith.constant 0 : i32
    return %c0_i32, %c0_i32_0 : i32, i32
  }
  func.func @transform_12(%arg0: i32) -> (i32, i32, i32) {
    %c0_i32 = arith.constant 0 : i32
    %c0_i32_0 = arith.constant 0 : i32
    %c0_i32_1 = arith.constant 0 : i32
    return %arg0, %c0_i32, %c0_i32_0 : i32, i32, i32
  }
}

module attributes {stable_mosaic.version = 11 : i64} {
  func.func @_fused_block_kernel(%arg0: i32, %arg1: memref<1x2x32xf32, #tpu.memory_space<vmem>>, %arg2: memref<1x32xf32, #tpu.memory_space<vmem>>, %arg3: memref<1x32xf32, #tpu.memory_space<vmem>>, %arg4: memref<32x384xf32, #tpu.memory_space<vmem>>, %arg5: memref<128x32xf32, #tpu.memory_space<vmem>>, %arg6: memref<1x32xf32, #tpu.memory_space<vmem>>, %arg7: memref<1x32xf32, #tpu.memory_space<vmem>>, %arg8: memref<1x32xf32, #tpu.memory_space<vmem>>, %arg9: memref<32x256xf32, #tpu.memory_space<vmem>>, %arg10: memref<1x256xf32, #tpu.memory_space<vmem>>, %arg11: memref<128x32xf32, #tpu.memory_space<vmem>>, %arg12: memref<1x32xf32, #tpu.memory_space<vmem>>, %arg13: memref<1x2x32xf32, #tpu.memory_space<vmem>>) attributes {dimension_semantics = [#tpu.dimension_semantics<parallel>], iteration_bounds = array<i64: 1>, scalar_prefetch = 0 : i64, scratch_operands = 0 : i64, tpu.core_type = #tpu.core_type<tc>, window_params = [{transform_indices = @transform_0, window_bounds = array<i64: 1, 2, 32>}, {pipeline_mode = #tpu.pipeline_mode<synchronous>, transform_indices = @transform_1, window_bounds = array<i64: 1, 32>}, {pipeline_mode = #tpu.pipeline_mode<synchronous>, transform_indices = @transform_2, window_bounds = array<i64: 1, 32>}, {pipeline_mode = #tpu.pipeline_mode<synchronous>, transform_indices = @transform_3, window_bounds = array<i64: 32, 384>}, {pipeline_mode = #tpu.pipeline_mode<synchronous>, transform_indices = @transform_4, window_bounds = array<i64: 128, 32>}, {pipeline_mode = #tpu.pipeline_mode<synchronous>, transform_indices = @transform_5, window_bounds = array<i64: 1, 32>}, {pipeline_mode = #tpu.pipeline_mode<synchronous>, transform_indices = @transform_6, window_bounds = array<i64: 1, 32>}, {pipeline_mode = #tpu.pipeline_mode<synchronous>, transform_indices = @transform_7, window_bounds = array<i64: 1, 32>}, {pipeline_mode = #tpu.pipeline_mode<synchronous>, transform_indices = @transform_8, window_bounds = array<i64: 32, 256>}, {pipeline_mode = #tpu.pipeline_mode<synchronous>, transform_indices = @transform_9, window_bounds = array<i64: 1, 256>}, {pipeline_mode = #tpu.pipeline_mode<synchronous>, transform_indices = @transform_10, window_bounds = array<i64: 128, 32>}, {pipeline_mode = #tpu.pipeline_mode<synchronous>, transform_indices = @transform_11, window_bounds = array<i64: 1, 32>}, {transform_indices = @transform_12, window_bounds = array<i64: 1, 2, 32>}]} {
    %c0 = arith.constant 0 : index
    %c0_0 = arith.constant 0 : index
    %c0_1 = arith.constant 0 : index
    %0 = vector.load %arg1[%c0, %c0_0, %c0_1] : memref<1x2x32xf32, #tpu.memory_space<vmem>>, vector<1x2x32xf32>
    %1 = vector.shape_cast %0 : vector<1x2x32xf32> to vector<2x32xf32>
    %c0_2 = arith.constant 0 : index
    %c0_3 = arith.constant 0 : index
    %2 = vector.load %arg2[%c0_2, %c0_3] : memref<1x32xf32, #tpu.memory_space<vmem>>, vector<1x32xf32>
    %c0_4 = arith.constant 0 : index
    %c0_5 = arith.constant 0 : index
    %3 = vector.load %arg3[%c0_4, %c0_5] : memref<1x32xf32, #tpu.memory_space<vmem>>, vector<1x32xf32>
    %cst = arith.constant dense<0.000000e+00> : vector<2xf32>
    %4 = vector.multi_reduction <add>, %1, %cst [1] : vector<2x32xf32> to vector<2xf32>
    %5 = vector.shape_cast %4 : vector<2xf32> to vector<2x1xf32>
    %cst_6 = arith.constant 3.200000e+01 : f32
    %6 = vector.broadcast %cst_6 : f32 to vector<2x1xf32>
    %7 = arith.divf %5, %6 : vector<2x1xf32>
    %8 = vector.broadcast %7 : vector<2x1xf32> to vector<2x32xf32>
    %9 = arith.subf %1, %8 : vector<2x32xf32>
    %10 = arith.mulf %9, %9 : vector<2x32xf32>
    %cst_7 = arith.constant dense<0.000000e+00> : vector<2xf32>
    %11 = vector.multi_reduction <add>, %10, %cst_7 [1] : vector<2x32xf32> to vector<2xf32>
    %12 = vector.shape_cast %11 : vector<2xf32> to vector<2x1xf32>
    %cst_8 = arith.constant 3.200000e+01 : f32
    %13 = vector.broadcast %cst_8 : f32 to vector<2x1xf32>
    %14 = arith.divf %12, %13 : vector<2x1xf32>
    %15 = vector.broadcast %7 : vector<2x1xf32> to vector<2x32xf32>
    %16 = arith.subf %1, %15 : vector<2x32xf32>
    %cst_9 = arith.constant 9.99999974E-6 : f32
    %17 = vector.broadcast %cst_9 : f32 to vector<2x1xf32>
    %18 = arith.addf %14, %17 : vector<2x1xf32>
    %19 = math.rsqrt %18 : vector<2x1xf32>
    %20 = vector.broadcast %19 : vector<2x1xf32> to vector<2x32xf32>
    %21 = arith.mulf %16, %20 : vector<2x32xf32>
    %22 = vector.broadcast %2 : vector<1x32xf32> to vector<2x32xf32>
    %23 = arith.mulf %21, %22 : vector<2x32xf32>
    %24 = vector.broadcast %3 : vector<1x32xf32> to vector<2x32xf32>
    %25 = arith.addf %23, %24 : vector<2x32xf32>
    %c0_10 = arith.constant 0 : index
    %c0_11 = arith.constant 0 : index
    %26 = vector.load %arg4[%c0_10, %c0_11] : memref<32x384xf32, #tpu.memory_space<vmem>>, vector<32x384xf32>
    %cst_12 = arith.constant dense<0.000000e+00> : vector<2x384xf32>
    %27 = tpu.matmul %25, %26, %cst_12 {dimension_numbers = #tpu.dot_dimension_numbers<[1], [0], [0], [1], [0, 0, 1, 1], [], []>} : vector<2x32xf32>, vector<32x384xf32>, vector<2x384xf32> -> vector<2x384xf32>
    %28 = vector.extract_strided_slice %27 {offsets = [0, 0], sizes = [2, 64], strides = [1, 1]} : vector<2x384xf32> to vector<2x64xf32>
    %29 = vector.extract_strided_slice %27 {offsets = [0, 128], sizes = [2, 64], strides = [1, 1]} : vector<2x384xf32> to vector<2x64xf32>
    %30 = vector.extract_strided_slice %27 {offsets = [0, 256], sizes = [2, 64], strides = [1, 1]} : vector<2x384xf32> to vector<2x64xf32>
    %cst_13 = arith.constant dense<0.000000e+00> : vector<2x2xf32>
    %31 = tpu.matmul %28, %29, %cst_13 {dimension_numbers = #tpu.dot_dimension_numbers<[1], [1], [0], [0], [0, 0, 1, 0], [], []>} : vector<2x64xf32>, vector<2x64xf32>, vector<2x2xf32> -> vector<2x2xf32>
    %cst_14 = arith.constant 1.250000e-01 : f32
    %32 = vector.broadcast %cst_14 : f32 to vector<2x2xf32>
    %33 = arith.mulf %31, %32 : vector<2x2xf32>
    %cst_15 = arith.constant dense<0xFF800000> : vector<2xf32>
    %34 = vector.multi_reduction <maximumf>, %33, %cst_15 [1] : vector<2x2xf32> to vector<2xf32>
    %35 = vector.shape_cast %34 : vector<2xf32> to vector<2x1xf32>
    %36 = vector.broadcast %35 : vector<2x1xf32> to vector<2x2xf32>
    %37 = arith.subf %33, %36 : vector<2x2xf32>
    %38 = math.exp %37 : vector<2x2xf32>
    %cst_16 = arith.constant dense<0.000000e+00> : vector<2xf32>
    %39 = vector.multi_reduction <add>, %38, %cst_16 [1] : vector<2x2xf32> to vector<2xf32>
    %40 = vector.shape_cast %39 : vector<2xf32> to vector<2x1xf32>
    %41 = vector.broadcast %40 : vector<2x1xf32> to vector<2x2xf32>
    %42 = arith.divf %38, %41 : vector<2x2xf32>
    %cst_17 = arith.constant dense<0.000000e+00> : vector<2x64xf32>
    %43 = tpu.matmul %42, %30, %cst_17 {dimension_numbers = #tpu.dot_dimension_numbers<[1], [0], [0], [1], [0, 0, 1, 1], [], []>} : vector<2x2xf32>, vector<2x64xf32>, vector<2x64xf32> -> vector<2x64xf32>
    %c0_18 = arith.constant 0 : index
    %c0_19 = arith.constant 0 : index
    %44 = vector.load %arg5[%c0_18, %c0_19] : memref<128x32xf32, #tpu.memory_space<vmem>>, vector<64x32xf32>
    %cst_20 = arith.constant dense<0.000000e+00> : vector<2x32xf32>
    %45 = tpu.matmul %43, %44, %cst_20 {dimension_numbers = #tpu.dot_dimension_numbers<[1], [0], [0], [1], [0, 0, 1, 1], [], []>} : vector<2x64xf32>, vector<64x32xf32>, vector<2x32xf32> -> vector<2x32xf32>
    %46 = vector.extract_strided_slice %27 {offsets = [0, 64], sizes = [2, 64], strides = [1, 1]} : vector<2x384xf32> to vector<2x64xf32>
    %47 = vector.extract_strided_slice %27 {offsets = [0, 192], sizes = [2, 64], strides = [1, 1]} : vector<2x384xf32> to vector<2x64xf32>
    %48 = vector.extract_strided_slice %27 {offsets = [0, 320], sizes = [2, 64], strides = [1, 1]} : vector<2x384xf32> to vector<2x64xf32>
    %cst_21 = arith.constant dense<0.000000e+00> : vector<2x2xf32>
    %49 = tpu.matmul %46, %47, %cst_21 {dimension_numbers = #tpu.dot_dimension_numbers<[1], [1], [0], [0], [0, 0, 1, 0], [], []>} : vector<2x64xf32>, vector<2x64xf32>, vector<2x2xf32> -> vector<2x2xf32>
    %cst_22 = arith.constant 1.250000e-01 : f32
    %50 = vector.broadcast %cst_22 : f32 to vector<2x2xf32>
    %51 = arith.mulf %49, %50 : vector<2x2xf32>
    %cst_23 = arith.constant dense<0xFF800000> : vector<2xf32>
    %52 = vector.multi_reduction <maximumf>, %51, %cst_23 [1] : vector<2x2xf32> to vector<2xf32>
    %53 = vector.shape_cast %52 : vector<2xf32> to vector<2x1xf32>
    %54 = vector.broadcast %53 : vector<2x1xf32> to vector<2x2xf32>
    %55 = arith.subf %51, %54 : vector<2x2xf32>
    %56 = math.exp %55 : vector<2x2xf32>
    %cst_24 = arith.constant dense<0.000000e+00> : vector<2xf32>
    %57 = vector.multi_reduction <add>, %56, %cst_24 [1] : vector<2x2xf32> to vector<2xf32>
    %58 = vector.shape_cast %57 : vector<2xf32> to vector<2x1xf32>
    %59 = vector.broadcast %58 : vector<2x1xf32> to vector<2x2xf32>
    %60 = arith.divf %56, %59 : vector<2x2xf32>
    %cst_25 = arith.constant dense<0.000000e+00> : vector<2x64xf32>
    %61 = tpu.matmul %60, %48, %cst_25 {dimension_numbers = #tpu.dot_dimension_numbers<[1], [0], [0], [1], [0, 0, 1, 1], [], []>} : vector<2x2xf32>, vector<2x64xf32>, vector<2x64xf32> -> vector<2x64xf32>
    %c64 = arith.constant 64 : index
    %c0_26 = arith.constant 0 : index
    %62 = vector.load %arg5[%c64, %c0_26] : memref<128x32xf32, #tpu.memory_space<vmem>>, vector<64x32xf32>
    %cst_27 = arith.constant dense<0.000000e+00> : vector<2x32xf32>
    %63 = tpu.matmul %61, %62, %cst_27 {dimension_numbers = #tpu.dot_dimension_numbers<[1], [0], [0], [1], [0, 0, 1, 1], [], []>} : vector<2x64xf32>, vector<64x32xf32>, vector<2x32xf32> -> vector<2x32xf32>
    %64 = arith.addf %45, %63 : vector<2x32xf32>
    %c0_28 = arith.constant 0 : index
    %c0_29 = arith.constant 0 : index
    %65 = vector.load %arg6[%c0_28, %c0_29] : memref<1x32xf32, #tpu.memory_space<vmem>>, vector<1x32xf32>
    %66 = vector.broadcast %65 : vector<1x32xf32> to vector<2x32xf32>
    %67 = arith.addf %64, %66 : vector<2x32xf32>
    %68 = arith.addf %67, %25 : vector<2x32xf32>
    %c0_30 = arith.constant 0 : index
    %c0_31 = arith.constant 0 : index
    %69 = vector.load %arg7[%c0_30, %c0_31] : memref<1x32xf32, #tpu.memory_space<vmem>>, vector<1x32xf32>
    %c0_32 = arith.constant 0 : index
    %c0_33 = arith.constant 0 : index
    %70 = vector.load %arg8[%c0_32, %c0_33] : memref<1x32xf32, #tpu.memory_space<vmem>>, vector<1x32xf32>
    %cst_34 = arith.constant dense<0.000000e+00> : vector<2xf32>
    %71 = vector.multi_reduction <add>, %68, %cst_34 [1] : vector<2x32xf32> to vector<2xf32>
    %72 = vector.shape_cast %71 : vector<2xf32> to vector<2x1xf32>
    %cst_35 = arith.constant 3.200000e+01 : f32
    %73 = vector.broadcast %cst_35 : f32 to vector<2x1xf32>
    %74 = arith.divf %72, %73 : vector<2x1xf32>
    %75 = vector.broadcast %74 : vector<2x1xf32> to vector<2x32xf32>
    %76 = arith.subf %68, %75 : vector<2x32xf32>
    %77 = arith.mulf %76, %76 : vector<2x32xf32>
    %cst_36 = arith.constant dense<0.000000e+00> : vector<2xf32>
    %78 = vector.multi_reduction <add>, %77, %cst_36 [1] : vector<2x32xf32> to vector<2xf32>
    %79 = vector.shape_cast %78 : vector<2xf32> to vector<2x1xf32>
    %cst_37 = arith.constant 3.200000e+01 : f32
    %80 = vector.broadcast %cst_37 : f32 to vector<2x1xf32>
    %81 = arith.divf %79, %80 : vector<2x1xf32>
    %82 = vector.broadcast %74 : vector<2x1xf32> to vector<2x32xf32>
    %83 = arith.subf %68, %82 : vector<2x32xf32>
    %cst_38 = arith.constant 9.99999974E-6 : f32
    %84 = vector.broadcast %cst_38 : f32 to vector<2x1xf32>
    %85 = arith.addf %81, %84 : vector<2x1xf32>
    %86 = math.rsqrt %85 : vector<2x1xf32>
    %87 = vector.broadcast %86 : vector<2x1xf32> to vector<2x32xf32>
    %88 = arith.mulf %83, %87 : vector<2x32xf32>
    %89 = vector.broadcast %69 : vector<1x32xf32> to vector<2x32xf32>
    %90 = arith.mulf %88, %89 : vector<2x32xf32>
    %91 = vector.broadcast %70 : vector<1x32xf32> to vector<2x32xf32>
    %92 = arith.addf %90, %91 : vector<2x32xf32>
    %c0_39 = arith.constant 0 : index
    %c0_40 = arith.constant 0 : index
    %93 = vector.load %arg9[%c0_39, %c0_40] : memref<32x256xf32, #tpu.memory_space<vmem>>, vector<32x256xf32>
    %cst_41 = arith.constant dense<0.000000e+00> : vector<2x256xf32>
    %94 = tpu.matmul %92, %93, %cst_41 {dimension_numbers = #tpu.dot_dimension_numbers<[1], [0], [0], [1], [0, 0, 1, 1], [], []>} : vector<2x32xf32>, vector<32x256xf32>, vector<2x256xf32> -> vector<2x256xf32>
    %c0_42 = arith.constant 0 : index
    %c0_43 = arith.constant 0 : index
    %95 = vector.load %arg10[%c0_42, %c0_43] : memref<1x256xf32, #tpu.memory_space<vmem>>, vector<1x256xf32>
    %96 = vector.broadcast %95 : vector<1x256xf32> to vector<2x256xf32>
    %97 = arith.addf %94, %96 : vector<2x256xf32>
    %98 = vector.extract_strided_slice %97 {offsets = [0, 0], sizes = [2, 128], strides = [1, 1]} : vector<2x256xf32> to vector<2x128xf32>
    %99 = vector.extract_strided_slice %97 {offsets = [0, 128], sizes = [2, 128], strides = [1, 1]} : vector<2x256xf32> to vector<2x128xf32>
    %cst_44 = arith.constant 5.000000e-01 : f32
    %100 = vector.broadcast %cst_44 : f32 to vector<2x128xf32>
    %101 = arith.mulf %100, %99 : vector<2x128xf32>
    %cst_45 = arith.constant 4.471500e-02 : f32
    %102 = vector.broadcast %cst_45 : f32 to vector<2x128xf32>
    %103 = arith.mulf %102, %99 : vector<2x128xf32>
    %104 = arith.mulf %103, %99 : vector<2x128xf32>
    %105 = arith.mulf %104, %99 : vector<2x128xf32>
    %106 = arith.addf %99, %105 : vector<2x128xf32>
    %cst_46 = arith.constant 0.797884583 : f32
    %107 = vector.broadcast %cst_46 : f32 to vector<2x128xf32>
    %108 = arith.mulf %107, %106 : vector<2x128xf32>
    %109 = math.tanh %108 : vector<2x128xf32>
    %cst_47 = arith.constant 1.000000e+00 : f32
    %110 = vector.broadcast %cst_47 : f32 to vector<2x128xf32>
    %111 = arith.addf %110, %109 : vector<2x128xf32>
    %112 = arith.mulf %101, %111 : vector<2x128xf32>
    %113 = arith.mulf %98, %112 : vector<2x128xf32>
    %c0_48 = arith.constant 0 : index
    %c0_49 = arith.constant 0 : index
    %114 = vector.load %arg11[%c0_48, %c0_49] : memref<128x32xf32, #tpu.memory_space<vmem>>, vector<128x32xf32>
    %cst_50 = arith.constant dense<0.000000e+00> : vector<2x32xf32>
    %115 = tpu.matmul %113, %114, %cst_50 {dimension_numbers = #tpu.dot_dimension_numbers<[1], [0], [0], [1], [0, 0, 1, 1], [], []>} : vector<2x128xf32>, vector<128x32xf32>, vector<2x32xf32> -> vector<2x32xf32>
    %c0_51 = arith.constant 0 : index
    %c0_52 = arith.constant 0 : index
    %116 = vector.load %arg12[%c0_51, %c0_52] : memref<1x32xf32, #tpu.memory_space<vmem>>, vector<1x32xf32>
    %117 = vector.broadcast %116 : vector<1x32xf32> to vector<2x32xf32>
    %118 = arith.addf %115, %117 : vector<2x32xf32>
    %119 = arith.addf %118, %92 : vector<2x32xf32>
    %c0_53 = arith.constant 0 : index
    %c0_54 = arith.constant 0 : index
    %c0_55 = arith.constant 0 : index
    %120 = vector.load %arg13[%c0_53, %c0_54, %c0_55] : memref<1x2x32xf32, #tpu.memory_space<vmem>>, vector<1x2x32xf32>
    %121 = vector.shape_cast %120 : vector<1x2x32xf32> to vector<2x32xf32>
    %122 = vector.shape_cast %119 : vector<2x32xf32> to vector<1x2x32xf32>
    tpu.vector_store %arg13[%c0_53, %c0_54, %c0_55], %122 {strides = array<i32>} : memref<1x2x32xf32, #tpu.memory_space<vmem>>, vector<1x2x32xf32>,
    return
  }
  func.func @transform_0(%arg0: i32) -> (i32, i32, i32) {
    %c0_i32 = arith.constant 0 : i32
    %c0_i32_0 = arith.constant 0 : i32
    %c0_i32_1 = arith.constant 0 : i32
    return %arg0, %c0_i32, %c0_i32_0 : i32, i32, i32
  }
  func.func @transform_1(%arg0: i32) -> (i32, i32) {
    %c0_i32 = arith.constant 0 : i32
    %c0_i32_0 = arith.constant 0 : i32
    %c0_i32_1 = arith.constant 0 : i32
    return %c0_i32, %c0_i32_0 : i32, i32
  }
  func.func @transform_2(%arg0: i32) -> (i32, i32) {
    %c0_i32 = arith.constant 0 : i32
    %c0_i32_0 = arith.constant 0 : i32
    %c0_i32_1 = arith.constant 0 : i32
    return %c0_i32, %c0_i32_0 : i32, i32
  }
  func.func @transform_3(%arg0: i32) -> (i32, i32) {
    %c0_i32 = arith.constant 0 : i32
    %c0_i32_0 = arith.constant 0 : i32
    %c0_i32_1 = arith.constant 0 : i32
    return %c0_i32, %c0_i32_0 : i32, i32
  }
  func.func @transform_4(%arg0: i32) -> (i32, i32) {
    %c0_i32 = arith.constant 0 : i32
    %c0_i32_0 = arith.constant 0 : i32
    %c0_i32_1 = arith.constant 0 : i32
    return %c0_i32, %c0_i32_0 : i32, i32
  }
  func.func @transform_5(%arg0: i32) -> (i32, i32) {
    %c0_i32 = arith.constant 0 : i32
    %c0_i32_0 = arith.constant 0 : i32
    %c0_i32_1 = arith.constant 0 : i32
    return %c0_i32, %c0_i32_0 : i32, i32
  }
  func.func @transform_6(%arg0: i32) -> (i32, i32) {
    %c0_i32 = arith.constant 0 : i32
    %c0_i32_0 = arith.constant 0 : i32
    %c0_i32_1 = arith.constant 0 : i32
    return %c0_i32, %c0_i32_0 : i32, i32
  }
  func.func @transform_7(%arg0: i32) -> (i32, i32) {
    %c0_i32 = arith.constant 0 : i32
    %c0_i32_0 = arith.constant 0 : i32
    %c0_i32_1 = arith.constant 0 : i32
    return %c0_i32, %c0_i32_0 : i32, i32
  }
  func.func @transform_8(%arg0: i32) -> (i32, i32) {
    %c0_i32 = arith.constant 0 : i32
    %c0_i32_0 = arith.constant 0 : i32
    %c0_i32_1 = arith.constant 0 : i32
    return %c0_i32, %c0_i32_0 : i32, i32
  }
  func.func @transform_9(%arg0: i32) -> (i32, i32) {
    %c0_i32 = arith.constant 0 : i32
    %c0_i32_0 = arith.constant 0 : i32
    %c0_i32_1 = arith.constant 0 : i32
    return %c0_i32, %c0_i32_0 : i32, i32
  }
  func.func @transform_10(%arg0: i32) -> (i32, i32) {
    %c0_i32 = arith.constant 0 : i32
    %c0_i32_0 = arith.constant 0 : i32
    %c0_i32_1 = arith.constant 0 : i32
    return %c0_i32, %c0_i32_0 : i32, i32
  }
  func.func @transform_11(%arg0: i32) -> (i32, i32) {
    %c0_i32 = arith.constant 0 : i32
    %c0_i32_0 = arith.constant 0 : i32
    %c0_i32_1 = arith.constant 0 : i32
    return %c0_i32, %c0_i32_0 : i32, i32
  }
  func.func @transform_12(%arg0: i32) -> (i32, i32, i32) {
    %c0_i32 = arith.constant 0 : i32
    %c0_i32_0 = arith.constant 0 : i32
    %c0_i32_1 = arith.constant 0 : i32
    return %arg0, %c0_i32, %c0_i32_0 : i32, i32, i32
  }
}

</mosaic_0001>

<bundles_post_ra>
// kernel: rowcol_forward.4
= control target key start
LH: loop header
LB: loop body
LE: loop exit
PB: predicated region body
PF: predicated region fallthrough
CT: control target
= control target key end

     0   :  { %s990_s21 = smov 0   ;;  %s1090_s0 = inlined_call_operand.vmem [shape: f32[2,4,8], index: 0, kind: input, shape index: {}]   ;;  %s1091_s1 = inlined_call_operand.vmem [shape: f32[1,8], index: 1, kind: input, shape index: {}]   ;;  %s1092_s2 = inlined_call_operand.vmem [shape: f32[1,8], index: 2, kind: input, shape index: {}]   ;;  %s1093_s3 = inlined_call_operand.vmem [shape: f32[8,48], index: 3, kind: input, shape index: {}]   ;;  %s1094_s4 = inlined_call_operand.vmem [shape: f32[16,8], index: 4, kind: input, shape index: {}]   ;;  %s1095_s5 = inlined_call_operand.vmem [shape: f32[1,8], index: 5, kind: input, shape index: {}]   ;;  %s1096_s6 = inlined_call_operand.vmem [shape: f32[1,8], index: 6, kind: input, shape index: {}]   ;;  %s1097_s7 = inlined_call_operand.vmem [shape: f32[1,8], index: 7, kind: input, shape index: {}]   ;;  %s1098_s8 = inlined_call_operand.vmem [shape: f32[8,64], index: 8, kind: input, shape index: {}]   ;;  %s1099_s9 = inlined_call_operand.vmem [shape: f32[1,64], index: 9, kind: input, shape index: {}]   ;;  %s1100_s10 = inlined_call_operand.vmem [shape: f32[32,8], index: 10, kind: input, shape index: {}]   ;;  %s1101_s11 = inlined_call_operand.vmem [shape: f32[1,8], index: 11, kind: input, shape index: {}]   ;;  %s1102_s12 = inlined_call_operand.vmem [shape: f32[2,4,8], index: 12, kind: output, shape index: {}]  }
   0x1 LB: > { %s852_s22 = sadd.s32 4294967295, %s917_s21   ;;  %p856_p0 = scmp.ge.s32.totalorder %s917_s21, 1  ;;  %s917_s21 = sphi %s990_s21, %s22_s21  }
   0x2   : > { %p361_p1 = scmp.lt.s32.totalorder %s917_s21, 3 }
   0x4   : > { %p362_p2 = pnand %p856_p0, %p361_p1 }
   0x5   : > { %p401_p3 = scmp.lt.s32.totalorder (!%p362_p2), %s852_s22, 1  ;;  %s920_s15 = smov (!%p362_p2), 112  }
   0x6   : > { %365 = sbr.rel (%p362_p2) target bundleno = 1866 (0x74a), region = 68  ;;  %s921_s16 = smov (!%p362_p2), 104  }
   0x7   : > { %s922_s17 = smov (!%p362_p2), 120   ;;  %s923_s18 = smov (!%p362_p2), 88  }
   0x8   : > { %s924_s19 = smov (!%p362_p2), 96  }
   0xb   : > { %s1104_s22 = smov (!%p401_p3, %s852_s22), 1  ;;  %vm412_vm0 = vcmask 60416   ;;  %v919_v2 = vmov 8.0   ;;  %v450_v14 = vld [vmem:[%s1093_s3] sm:$0xff]  ;;  %vm451_vm5 = vcmask 64512   ;;  %vm503_vm6 = vcmask 27648  }
   0xc   : > { %s857_s23 = sshll.u32 %s1104_s22, 2  ;;  %895 = vrcp.f32 %v919_v2  ;;  %470 = vmatpush.msra.mxu0 %v450_v14  ;;  %v888_v24 = vld [vmem:[%s1091_s1] ss:$0 sm:$0xff]  ;;  %vm534_vm7 = vcmask 1043456  }
   0xd   : > { %s404_s26 = scalar_lea.vmem %s1090_s0, %s857_s23  ;;  %v889_v27 = vld [vmem:[%s1092_s2] ss:$0 sm:$0xff] }
   0xe   : > { %v409_v0 = vld [vmem:[%s404_s26] sm:$0xf] }
   0xf   : > { %v413_v1 = vsel %vm412_vm0, %v409_v0, 0.0  ;;  %v557_v14 = vld [vmem:[%s1094_s4] sm:$0xff] }
  0x10   : > { %414 = vadd.xlane.f32.xlu0 %v413_v1 }
  0x12   : > { %v896_v3 = vpop.eup %895 }
  0x13   : > { %v417_v4 = vmul.f32 8.0, %v896_v3  ;;  %vm421_vm1 = vweird.f32 %v896_v3 }
  0x15   : > { %v418_v5 = vsub.f32 1.0, %v417_v4 }
  0x17   : > { %v419_v6 = vmul.f32 %v896_v3, %v418_v5 }
  0x19   : > { %v420_v7 = vadd.f32 %v896_v3, %v419_v6 }
  0x1b   : > { %v1007_v8 = vsel %vm421_vm1, %v896_v3, %v420_v7  ;;  %vm530_vm1 = vcmask 31744  }
  0x83   : > { %v415_v9 = vpop.xlane.xlu0 %414 }
  0x84   : > { %v423_v10 = vmul.f32 %v1007_v8, %v415_v9 }
  0x86   : > { %v424_v11 = vsub.f32 %v409_v0, %v423_v10 }
  0x88   : > { %v425_v12 = vmul.f32 %v424_v11, %v424_v11 }
  0x8a   : > { %v426_v13 = vsel %vm412_vm0, %v425_v12, 0.0 }
  0x8b   : > { %427 = vadd.xlane.f32.xlu0 %v426_v13  ;;  %v638_v13 = vld [vmem:[%s1094_s4 + $0x8] sm:$0xff] }
  0xfe   : > { %v428_v15 = vpop.xlane.xlu0 %427 }
  0xff   : > { %v429_v16 = vmul.f32 %v428_v15, %v1007_v8 }
 0x101   : > { %v430_v17 = vadd.f32 1e-05, %v429_v16 }
 0x103   : > { %897 = vrsqrt.f32 %v430_v17  ;;  %vm437_vm3 = vweird.f32 %v430_v17 }
 0x109   : > { %v898_v18 = vpop.eup %897 }
 0x10a   : > { %v432_v19 = vmul.f32 %v898_v18, %v430_v17  ;;  %vm438_vm2 = vweird.f32 %v898_v18 }
 0x10b   : > { %vm439_vm4 = vmor %vm437_vm3, %vm438_vm2 }
 0x10c   : > { %v433_v20 = vmul.f32 %v898_v18, %v432_v19 }
 0x10e   : > { %v434_v21 = vmul.f32 0.5, %v433_v20 }
 0x110   : > { %v435_v22 = vsub.f32 1.5, %v434_v21 }
 0x112   : > { %v436_v23 = vmul.f32 %v898_v18, %v435_v22 }
 0x114   : > { %v440_v25 = vsel %vm439_vm4, %v898_v18, %v436_v23  ;;  %v890_v18 = vld [vmem:[%s1095_s5] ss:$0 sm:$0xff] }
 0x115   : > { %v441_v26 = vmul.f32 %v440_v25, %v424_v11 }
 0x117   : > { %v445_v28 = vmul.f32 %v888_v24, %v441_v26 }
 0x119   : > { %v1021_v29 = vadd.f32 %v889_v27, %v445_v28 }
 0x11b   : > { %859 = vmatmul.msk.f32.vlgmr.msra.gmra.mxu0 %vm451_vm5, %v1021_v29 }
 0x198   : > { %v472_v30 = vpop.f32.mrf.mxu0 }
 0x199   : > { %476 = vrot.lane.b32.xlu2 %v472_v30, %s920_s15  ;;  %560 = vrot.lane.b32.xlu1 %v472_v30, %s921_s16 }
 0x1a1   : > { %558 = vrot.lane.b32.xlu1 %v472_v30, %s922_s17 }
 0x1f3   : > { %v477_v31 = vpop.permute.xlu2 %476 }
 0x1f4   : > { %860 = vmatpush.xpose.msk.msra.mxu1 %vm451_vm5, %v477_v31 }
 0x1f7   : > { %861 = vmatmul.msk.f32.vlgmr.msra.gmra.mxu1 %vm451_vm5, %v472_v30 }
 0x1f8   : > { %680 = vmatpush.msrb.mxu1 %v557_v14 }
 0x20b   : > { %v561_v32 = vpop.permute.xlu1 %560 }
 0x20c   : > { %864 = vmatpush.xpose.msk.msra.mxu3 %vm451_vm5, %v561_v32 }
 0x213   : > { %v559_v33 = vpop.permute.xlu1 %558 }
 0x214   : > { %865 = vmatmul.msk.f32.vlgmr.msra.gmra.mxu3 %vm451_vm5, %v559_v33 }
 0x274   : > { %v499_v34 = vpop.f32.mrf.mxu1 }
 0x275   : > { %v502_v35 = vmul.f32 0.35355338, %v499_v34 }
 0x277   : > { %v504_v36 = vsel %vm503_vm6, %v502_v35, -inf }
 0x278   : > { %505 = vmax.xlane.f32.xlu2 %v504_v36 }
 0x290   : > { %611 = vrot.lane.b32.xlu2 %v472_v30, %s923_s18 }
 0x297   : > { %v583_v37 = vpop.f32.mrf.mxu3 }
 0x298   : > { %v586_v38 = vmul.f32 0.35355338, %v583_v37 }
 0x29a   : > { %v587_v39 = vsel %vm503_vm6, %v586_v38, -inf }
 0x29b   : > { %588 = vmax.xlane.f32.xlu0 %v587_v39  ;;  %v891_v39 = vld [vmem:[%s1096_s6] ss:$0 sm:$0xff] }
 0x2eb   : > { %v506_v40 = vpop.xlane.xlu2 %505 }
 0x2ec   : > { %v507_v41 = vsub.f32 %v502_v35, %v506_v40 }
 0x2ee   : > { %v508_v42 = vmul.f32 1.442695, %v507_v41 }
 0x2f0   : > { %899 = vpow2.f32 %v508_v42 }
 0x2f3   : > { %v612_v43 = vpop.permute.xlu2 %611 }
 0x2f4   : > { %866 = vmatpush.msk.msrb.mxu0 %vm534_vm7, %v612_v43 }
 0x2f6   : > { %v900_v44 = vpop.eup %899 }
 0x2f7   : > { %v510_v45 = vsel %vm503_vm6, %v900_v44, 0.0 }
 0x2f8   : > { %511 = vadd.xlane.f32.xlu1 %v510_v45  ;;  %v767_v45 = vld [vmem:[%s1100_s10 + $0x10] sm:$0xff] }
 0x30e   : > { %v589_v46 = vpop.xlane.xlu0 %588 }
 0x30f   : > { %v590_v47 = vsub.f32 %v586_v38, %v589_v46  ;;  %v766_v46 = vld [vmem:[%s1100_s10 + $0x8] sm:$0xff] }
 0x311   : > { %v591_v48 = vmul.f32 1.442695, %v590_v47  ;;  %v893_v47 = vld [vmem:[%s1099_s9] ss:$0 sm:$0xff] }
 0x313   : > { %901 = vpow2.f32 %v591_v48 }
 0x319   : > { %v902_v49 = vpop.eup %901 }
 0x31a   : > { %v593_v50 = vsel %vm503_vm6, %v902_v49, 0.0 }
 0x31b   : > { %594 = vadd.xlane.f32.xlu0 %v593_v50 }
 0x32f   : > { %528 = vrot.lane.b32.xlu0 %v472_v30, %s924_s19  ;;  %v723_v30 = vld [vmem:[%s1098_s8] sm:$0xff] }
 0x330   : > { %746 = vmatpush.msrb.mxu3 %v723_v30 }
 0x36b   : > { %v512_v51 = vpop.xlane.xlu1 %511 }
 0x36c   : > { %903 = vrcp.f32 %v512_v51  ;;  %v524_v60 = vand.u32 2147483648, %v512_v51  ;;  %vm518_vm9 = vweird.f32 %v512_v51  ;;  %v522_v63 = vand.u32 2147483647, %v512_v51 }
 0x36e   : > { %v525_v3 = vor.u32 1.1754944e-38, %v524_v60  ;;  %vm523_vm14 = vcmp.eq.f32.partialorder %v522_v63, 8.507059e+37 }
 0x372   : > { %v904_v52 = vpop.eup %903 }
 0x373   : > { %v514_v53 = vmul.f32 %v904_v52, %v512_v51  ;;  %vm519_vm8 = vweird.f32 %v904_v52 }
 0x374   : > { %vm520_vm11 = vmor %vm518_vm9, %vm519_vm8 }
 0x375   : > { %v515_v55 = vsub.f32 1.0, %v514_v53 }
 0x377   : > { %v516_v56 = vmul.f32 %v904_v52, %v515_v55 }
 0x379   : > { %v517_v59 = vadd.f32 %v904_v52, %v516_v56 }
 0x37b   : > { %v521_v2 = vsel %vm520_vm11, %v904_v52, %v517_v59  ;;  %v765_v59 = vld [vmem:[%s1100_s10] sm:$0xff] }
 0x37c   : > { %v526_v7 = vsel %vm523_vm14, %v525_v3, %v521_v2 }
 0x37d   : > { %v527_v12 = vmul.f32 %v900_v44, %v526_v7  ;;  %v768_v44 = vld [vmem:[%s1100_s10 + $0x18] sm:$0xff] }
 0x37e   : > { %789 = vmatpush.msra.mxu0 %v768_v44 }
 0x380   : > { %790 = vmatpush.msra.mxu0 %v767_v45 }
 0x382   : > { %791 = vmatpush.msra.mxu0 %v766_v46 }
 0x384   : > { %792 = vmatpush.msra.mxu0 %v765_v59 }
 0x38e   : > { %v595_v54 = vpop.xlane.xlu0 %594 }
 0x38f   : > { %905 = vrcp.f32 %v595_v54  ;;  %v607_v62 = vand.u32 2147483648, %v595_v54  ;;  %v605_v1 = vand.u32 2147483647, %v595_v54  ;;  %vm601_vm12 = vweird.f32 %v595_v54 }
 0x391   : > { %v608_v5 = vor.u32 1.1754944e-38, %v607_v62  ;;  %vm606_vm15 = vcmp.eq.f32.partialorder %v605_v1, 8.507059e+37  ;;  %v894_v62 = vld [vmem:[%s1101_s11] ss:$0 sm:$0xff] }
 0x395   : > { %v906_v57 = vpop.eup %905 }
 0x396   : > { %v597_v58 = vmul.f32 %v906_v57, %v595_v54  ;;  %vm602_vm10 = vweird.f32 %v906_v57 }
 0x397   : > { %vm603_vm13 = vmor %vm601_vm12, %vm602_vm10 }
 0x398   : > { %v598_v61 = vsub.f32 1.0, %v597_v58 }
 0x39a   : > { %v599_v0 = vmul.f32 %v906_v57, %v598_v61 }
 0x39c   : > { %v600_v4 = vadd.f32 %v906_v57, %v599_v0 }
 0x39e   : > { %v604_v6 = vsel %vm603_vm13, %v906_v57, %v600_v4 }
 0x39f   : > { %v609_v9 = vsel %vm606_vm15, %v608_v5, %v604_v6 }
 0x3a0   : > { %v610_v10 = vmul.f32 %v902_v49, %v609_v9 }
 0x3a1   : > { %v529_v11 = vpop.permute.xlu0 %528 }
 0x3a2   : > { %862 = vmatpush.msk.msra.mxu2 %vm534_vm7, %v529_v11  ;;  %867 = vmatmul.msk.f32.vlgmr.msrb.gmra.mxu0 %vm530_vm1, %v610_v10 }
 0x3a3   : > { %863 = vmatmul.msk.f32.vlgmr.msra.gmra.mxu2 %vm530_vm1, %v527_v12 }
 0x3a4   : > { %657 = vmatpush.msrb.mxu2 %v638_v13 }
 0x41f   : > { %v635_v15 = vpop.f32.mrf.mxu0 }
 0x420   : > { %868 = vmatmul.msk.f32.vlgmr.msrb.gmra.mxu2 %vm451_vm5, %v635_v15 }
 0x426   : > { %v554_v16 = vpop.f32.mrf.mxu2 }
 0x427   : > { %869 = vmatmul.msk.f32.vlgmr.msrb.gmra.mxu1 %vm451_vm5, %v554_v16 }
 0x4a3   : > { %v659_v17 = vpop.f32.mrf.mxu2 }
 0x4a4   : > { %v682_v19 = vpop.f32.mrf.mxu1 }
 0x4a5   : > { %v683_v20 = vadd.f32 %v682_v19, %v659_v17 }
 0x4a7   : > { %v689_v21 = vadd.f32 %v890_v18, %v683_v20 }
 0x4a9   : > { %v690_v22 = vadd.f32 %v689_v21, %v1021_v29 }
 0x4ab   : > { %v693_v23 = vsel %vm412_vm0, %v690_v22, 0.0 }
 0x4ac   : > { %694 = vadd.xlane.f32.xlu0 %v693_v23 }
 0x51f   : > { %v695_v24 = vpop.xlane.xlu0 %694 }
 0x520   : > { %v696_v25 = vmul.f32 %v695_v24, %v1007_v8 }
 0x522   : > { %v697_v26 = vsub.f32 %v690_v22, %v696_v25 }
 0x524   : > { %v698_v27 = vmul.f32 %v697_v26, %v697_v26 }
 0x526   : > { %v699_v28 = vsel %vm412_vm0, %v698_v27, 0.0 }
 0x527   : > { %700 = vadd.xlane.f32.xlu1 %v699_v28 }
 0x59a   : > { %v701_v31 = vpop.xlane.xlu1 %700 }
 0x59b   : > { %v702_v32 = vmul.f32 %v701_v31, %v1007_v8  ;;  %v892_v8 = vld [vmem:[%s1097_s7] ss:$0 sm:$0xff] }
 0x59d   : > { %v703_v29 = vadd.f32 1e-05, %v702_v32 }
 0x59f   : > { %907 = vrsqrt.f32 %v703_v29  ;;  %vm710_vm3 = vweird.f32 %v703_v29 }
 0x5a5   : > { %v908_v33 = vpop.eup %907 }
 0x5a6   : > { %v705_v34 = vmul.f32 %v908_v33, %v703_v29  ;;  %vm711_vm2 = vweird.f32 %v908_v33 }
 0x5a7   : > { %vm712_vm4 = vmor %vm710_vm3, %vm711_vm2 }
 0x5a8   : > { %v706_v35 = vmul.f32 %v908_v33, %v705_v34 }
 0x5aa   : > { %v707_v36 = vmul.f32 0.5, %v706_v35 }
 0x5ac   : > { %v708_v37 = vsub.f32 1.5, %v707_v36 }
 0x5ae   : > { %v709_v38 = vmul.f32 %v908_v33, %v708_v37 }
 0x5b0   : > { %v713_v40 = vsel %vm712_vm4, %v908_v33, %v709_v38 }
 0x5b1   : > { %v714_v41 = vmul.f32 %v713_v40, %v697_v26 }
 0x5b3   : > { %v718_v42 = vmul.f32 %v891_v39, %v714_v41 }
 0x5b5   : > { %v722_v43 = vadd.f32 %v892_v8, %v718_v42 }
 0x5b7   : > { %870 = vmatmul.msk.f32.vlgmr.msrb.gmra.mxu3 %vm451_vm5, %v722_v43  ;;  %vm773_vm5 = vcmask 261120  }
 0x63a   : > { %v748_v48 = vpop.f32.mrf.mxu3 }
 0x63b   : > { %v749_v49 = vadd.f32 %v893_v47, %v748_v48 }
 0x63d   : > { %v752_v50 = vmul.f32 0.044715, %v749_v49  ;;  %v751_v56 = vmul.f32 0.5, %v749_v49 }
 0x63f   : > { %v753_v51 = vmul.f32 %v752_v50, %v749_v49 }
 0x641   : > { %v754_v52 = vmul.f32 %v753_v51, %v749_v49 }
 0x643   : > { %v755_v53 = vadd.f32 %v754_v52, %v749_v49 }
 0x645   : > { %v756_v54 = vmul.f32 0.7978846, %v755_v53 }
 0x647   : > { %909 = vtanh.f32 %v756_v54 }
 0x64d   : > { %v910_v55 = vpop.eup %909 }
 0x64e   : > { %v758_v57 = vadd.f32 1.0, %v910_v55 }
 0x650   : > { %v759_v58 = vmul.f32 %v758_v57, %v751_v56 }
 0x652   : > { %761 = vrot.lane.b32.xlu1 %v759_v58, %s924_s19  ;;  %s408_s19 = scalar_lea.vmem %s1102_s12, %s857_s23 }
 0x6c4   : > { %v762_v60 = vpop.permute.xlu1 %761 }
 0x6c5   : > { %v764_v61 = vmul.f32 %v762_v60, %v749_v49 }
 0x6c7   : > { %871 = vmatmul.msk.f32.vlgmr.msra.gmra.mxu0 %vm773_vm5, %v764_v61 }
 0x744   : > { %v794_v63 = vpop.f32.mrf.mxu0 }
 0x745   : > { %v795_v0 = vadd.f32 %v894_v62, %v794_v63 }
 0x747   : > { %v797_v1 = vadd.f32 %v795_v0, %v722_v43 }
 0x749   : > { %798 = vst.msk [vmem:[%s408_s19] sm:$0xf] %vm412_vm0, %v797_v1 }
 0x74a PF: > { %s22_s21 = sadd.s32 1, %s917_s21  }
 0x74b   : > { %p19_p4 = scmp.ge.s32.totalorder %s22_s21, 4  }
 0x74d   :  { %21 = sbr.rel (!%p19_p4) target bundleno = 1 (0x1), region = 98 }

// kernel: rowcol_forward.5
= control target key start
LH: loop header
LB: loop body
LE: loop exit
PB: predicated region body
PF: predicated region fallthrough
CT: control target
= control target key end

     0   :  { %vm44_vm0 = vcmask 254976   ;;  %v571_v2 = vmov 32.0   ;;  %vm94_vm5 = vcmask 261120   ;;  %vm158_vm6 = vcmask 523264   ;;  %s861_s0 = inlined_call_operand.vmem [shape: f32[1,2,32], index: 0, kind: input, shape index: {}]   ;;  %s862_s1 = inlined_call_operand.vmem [shape: f32[1,32], index: 1, kind: input, shape index: {}]   ;;  %s863_s2 = inlined_call_operand.vmem [shape: f32[1,32], index: 2, kind: input, shape index: {}]   ;;  %s864_s3 = inlined_call_operand.vmem [shape: f32[32,384], index: 3, kind: input, shape index: {}]   ;;  %s865_s4 = inlined_call_operand.vmem [shape: f32[128,32], index: 4, kind: input, shape index: {}]   ;;  %s866_s5 = inlined_call_operand.vmem [shape: f32[1,32], index: 5, kind: input, shape index: {}]   ;;  %s867_s6 = inlined_call_operand.vmem [shape: f32[1,32], index: 6, kind: input, shape index: {}]   ;;  %s868_s7 = inlined_call_operand.vmem [shape: f32[1,32], index: 7, kind: input, shape index: {}]   ;;  %s869_s8 = inlined_call_operand.vmem [shape: f32[32,256], index: 8, kind: input, shape index: {}]   ;;  %s870_s10 = inlined_call_operand.vmem [shape: f32[128,32], index: 10, kind: input, shape index: {}]   ;;  %s871_s11 = inlined_call_operand.vmem [shape: f32[1,32], index: 11, kind: input, shape index: {}]   ;;  %s872_s9 = inlined_call_operand.vmem [shape: f32[1,256], index: 9, kind: input, shape index: {}]   ;;  %s873_s12 = inlined_call_operand.vmem [shape: f32[1,2,32], index: 12, kind: output, shape index: {}]  }
   0x1   :  { %v41_v0 = vld [vmem:[%s861_s0] sm:$0x3]  ;;  %555 = vrcp.f32 %v571_v2  ;;  %v91_v14 = vld [vmem:[%s864_s3 + $0x48] sm:$0xff]  ;;  %v93_v15 = vld [vmem:[%s864_s3 + $0x58] sm:$0xff]  ;;  %vm215_vm7 = vcmask 1041408   ;;  %vm186_vm8 = vcmask 9216  }
   0x2   :  { %v45_v1 = vsel %vm44_vm0, %v41_v0, 0.0  ;;  %110 = vmatpush.msra.mxu1 %v91_v14  ;;  %150 = vmatpush.msra.mxu2 %v93_v15  ;;  %v88_v16 = vld [vmem:[%s864_s3 + $0x30] sm:$0xff]  ;;  %v90_v17 = vld [vmem:[%s864_s3 + $0x40] sm:$0xff]  ;;  %v85_v18 = vld [vmem:[%s864_s3 + $0x18] sm:$0xff]  ;;  %vm211_vm13 = vcmask 15360  }
   0x3   :  { %46 = vadd.xlane.f32.xlu0 %v45_v1  ;;  %v87_v19 = vld [vmem:[%s864_s3 + $0x28] sm:$0xff]  ;;  %v82_v20 = vld [vmem:[%s864_s3] sm:$0xff]  ;;  %v84_v21 = vld [vmem:[%s864_s3 + $0x10] sm:$0xff] }
   0x4   :  { %111 = vmatpush.msra.mxu1 %v88_v16  ;;  %151 = vmatpush.msra.mxu2 %v90_v17  ;;  %v92_v22 = vld [vmem:[%s864_s3 + $0x50] sm:$0xff]  ;;  %v89_v23 = vld [vmem:[%s864_s3 + $0x38] sm:$0xff]  ;;  %v86_v24 = vld [vmem:[%s864_s3 + $0x20] sm:$0xff] }
   0x5   :  { %v83_v27 = vld [vmem:[%s864_s3 + $0x8] sm:$0xff]  ;;  %v549_v35 = vld [vmem:[%s862_s1] ss:$0 sm:$0xff]  ;;  %s572_s1 = smov 64   ;;  %v242_v16 = vld [vmem:[%s865_s4 + $0x18] sm:$0xff] }
   0x6   :  { %112 = vmatpush.msra.mxu1 %v85_v18  ;;  %152 = vmatpush.msra.mxu2 %v87_v19  ;;  %v550_v38 = vld [vmem:[%s863_s2] ss:$0 sm:$0xff]  ;;  %v244_v14 = vld [vmem:[%s865_s4 + $0x28] sm:$0xff]  ;;  %v241_v17 = vld [vmem:[%s865_s4 + $0x10] sm:$0xff] }
   0x7   :  { %v556_v3 = vpop.eup %555  ;;  %v243_v15 = vld [vmem:[%s865_s4 + $0x20] sm:$0xff]  ;;  %v240_v18 = vld [vmem:[%s865_s4 + $0x8] sm:$0xff] }
   0x8   :  { %v49_v4 = vmul.f32 32.0, %v556_v3  ;;  %vm53_vm1 = vweird.f32 %v556_v3  ;;  %113 = vmatpush.msra.mxu1 %v82_v20  ;;  %153 = vmatpush.msra.mxu2 %v84_v21  ;;  %v239_v20 = vld [vmem:[%s865_s4] sm:$0xff]  ;;  %v334_v21 = vld [vmem:[%s865_s4 + $0x78] sm:$0xff] }
   0xa   :  { %v50_v5 = vsub.f32 1.0, %v49_v4  ;;  %130 = vmatpush.msrb.mxu1 %v92_v22  ;;  %v333_v22 = vld [vmem:[%s865_s4 + $0x70] sm:$0xff]  ;;  %346 = vmatpush.msrb.mxu2 %v334_v21  ;;  %v493_v21 = vld [vmem:[%s870_s10 + $0x38] sm:$0xff] }
   0xc   :  { %v51_v6 = vmul.f32 %v556_v3, %v50_v5  ;;  %131 = vmatpush.msrb.mxu1 %v89_v23  ;;  %347 = vmatpush.msrb.mxu2 %v333_v22  ;;  %v492_v22 = vld [vmem:[%s870_s10 + $0x30] sm:$0xff] }
   0xe   :  { %v52_v7 = vadd.f32 %v556_v3, %v51_v6  ;;  %132 = vmatpush.msrb.mxu1 %v86_v24 }
  0x10   :  { %v642_v8 = vsel %vm53_vm1, %v556_v3, %v52_v7  ;;  %133 = vmatpush.msrb.mxu1 %v83_v27  ;;  %v331_v27 = vld [vmem:[%s865_s4 + $0x60] sm:$0xff] }
  0x76   :  { %v47_v9 = vpop.xlane.xlu0 %46 }
  0x77   :  { %v55_v10 = vmul.f32 %v642_v8, %v47_v9 }
  0x79   :  { %v56_v11 = vsub.f32 %v41_v0, %v55_v10 }
  0x7b   :  { %v57_v12 = vmul.f32 %v56_v11, %v56_v11 }
  0x7d   :  { %v58_v13 = vsel %vm44_vm0, %v57_v12, 0.0  ;;  %v246_v12 = vld [vmem:[%s865_s4 + $0x38] sm:$0xff] }
  0x7e   :  { %59 = vadd.xlane.f32.xlu0 %v58_v13  ;;  %v245_v13 = vld [vmem:[%s865_s4 + $0x30] sm:$0xff] }
  0xf1   :  { %v60_v25 = vpop.xlane.xlu0 %59 }
  0xf2   :  { %v61_v26 = vmul.f32 %v60_v25, %v642_v8  ;;  %v332_v25 = vld [vmem:[%s865_s4 + $0x68] sm:$0xff] }
  0xf3   :  { %348 = vmatpush.msrb.mxu2 %v332_v25  ;;  %v489_v25 = vld [vmem:[%s870_s10 + $0x18] sm:$0xff] }
  0xf4   :  { %v62_v28 = vadd.f32 1e-05, %v61_v26 }
  0xf5   :  { %349 = vmatpush.msrb.mxu2 %v331_v27  ;;  %v487_v27 = vld [vmem:[%s870_s10 + $0x8] sm:$0xff] }
  0xf6   :  { %557 = vrsqrt.f32 %v62_v28  ;;  %vm69_vm3 = vweird.f32 %v62_v28 }
  0xfc   :  { %v558_v29 = vpop.eup %557 }
  0xfd   :  { %v64_v30 = vmul.f32 %v558_v29, %v62_v28  ;;  %vm70_vm2 = vweird.f32 %v558_v29 }
  0xfe   :  { %vm71_vm4 = vmor %vm69_vm3, %vm70_vm2 }
  0xff   :  { %v65_v31 = vmul.f32 %v558_v29, %v64_v30 }
 0x101   :  { %v66_v32 = vmul.f32 0.5, %v65_v31  ;;  %v330_v31 = vld [vmem:[%s865_s4 + $0x58] sm:$0xff] }
 0x102   :  { %350 = vmatpush.msrb.mxu2 %v330_v31 }
 0x103   :  { %v67_v33 = vsub.f32 1.5, %v66_v32 }
 0x105   :  { %v68_v34 = vmul.f32 %v558_v29, %v67_v33  ;;  %v329_v33 = vld [vmem:[%s865_s4 + $0x50] sm:$0xff] }
 0x106   :  { %351 = vmatpush.msrb.mxu2 %v329_v33 }
 0x107   :  { %v72_v36 = vsel %vm71_vm4, %v558_v29, %v68_v34 }
 0x108   :  { %v73_v37 = vmul.f32 %v72_v36, %v56_v11  ;;  %v328_v36 = vld [vmem:[%s865_s4 + $0x48] sm:$0xff] }
 0x109   :  { %352 = vmatpush.msrb.mxu2 %v328_v36 }
 0x10a   :  { %v77_v39 = vmul.f32 %v549_v35, %v73_v37 }
 0x10c   :  { %v689_v40 = vadd.f32 %v550_v38, %v77_v39 }
 0x10e   :  { %532 = vmatmul.msk.f32.vlgmr.msra.gmra.mxu1 %vm94_vm5, %v689_v40  ;;  %534 = vmatmul.msk.f32.vlgmr.msra.gmra.mxu2 %vm94_vm5, %v689_v40 }
 0x116   :  { %533 = vmatmul.msk.f32.vlgmr.msrb.gmra.mxu1 %vm94_vm5, %v689_v40 }
 0x18b   :  { %v115_v41 = vpop.f32.mrf.mxu1 }
 0x191   :  { %v155_v43 = vpop.f32.mrf.mxu2 }
 0x193   :  { %v135_v42 = vpop.f32.mrf.mxu1 }
 0x194   :  { %249 = vrot.lane.b32.xlu1 %v135_v42, %s572_s1  ;;  %535 = vmatpush.xpose.msk.msra.mxu3 %vm158_vm6, %v135_v42 }
 0x197   :  { %536 = vmatmul.msk.f32.vlgmr.msra.gmra.mxu3 %vm158_vm6, %v115_v41 }
 0x198   :  { %537 = vmatpush.msk.msrb.mxu3 %vm215_vm7, %v155_v43 }
 0x19a   :  { %369 = vmatpush.msra.mxu3 %v246_v12 }
 0x19c   :  { %247 = vrot.lane.b32.xlu1 %v115_v41, %s572_s1  ;;  %370 = vmatpush.msra.mxu3 %v245_v13  ;;  %v327_v41 = vld [vmem:[%s865_s4 + $0x40] sm:$0xff] }
 0x19d   :  { %353 = vmatpush.msrb.mxu2 %v327_v41 }
 0x19e   :  { %371 = vmatpush.msra.mxu3 %v244_v14 }
 0x1a0   :  { %372 = vmatpush.msra.mxu3 %v243_v15 }
 0x1a2   :  { %373 = vmatpush.msra.mxu3 %v242_v16  ;;  %v498_v16 = vld [vmem:[%s870_s10 + $0x60] sm:$0xff] }
 0x1a4   :  { %374 = vmatpush.msra.mxu3 %v241_v17  ;;  %v497_v17 = vld [vmem:[%s870_s10 + $0x58] sm:$0xff] }
 0x1a6   :  { %375 = vmatpush.msra.mxu3 %v240_v18  ;;  %v496_v18 = vld [vmem:[%s870_s10 + $0x50] sm:$0xff] }
 0x1a8   :  { %376 = vmatpush.msra.mxu3 %v239_v20  ;;  %v494_v20 = vld [vmem:[%s870_s10 + $0x40] sm:$0xff] }
 0x206   :  { %v250_v44 = vpop.permute.xlu1 %249 }
 0x207   :  { %539 = vmatpush.xpose.msk.msra.mxu0 %vm158_vm6, %v250_v44 }
 0x20e   :  { %v248_v45 = vpop.permute.xlu1 %247 }
 0x20f   :  { %540 = vmatmul.msk.f32.vlgmr.msra.gmra.mxu0 %vm158_vm6, %v248_v45 }
 0x21a   :  { %v182_v46 = vpop.f32.mrf.mxu3 }
 0x21b   :  { %v185_v47 = vmul.f32 0.125, %v182_v46 }
 0x21d   :  { %v187_v48 = vsel %vm186_vm8, %v185_v47, -inf }
 0x21e   :  { %188 = vmax.xlane.f32.xlu2 %v187_v48 }
 0x28c   :  { %v272_v49 = vpop.f32.mrf.mxu0 }
 0x28d   :  { %v275_v50 = vmul.f32 0.125, %v272_v49 }
 0x28f   :  { %v276_v51 = vsel %vm186_vm8, %v275_v50, -inf }
 0x290   :  { %277 = vmax.xlane.f32.xlu2 %v276_v51 }
 0x291   :  { %v189_v52 = vpop.xlane.xlu2 %188 }
 0x292   :  { %v190_v53 = vsub.f32 %v185_v47, %v189_v52 }
 0x294   :  { %v191_v54 = vmul.f32 1.442695, %v190_v53 }
 0x296   :  { %559 = vpow2.f32 %v191_v54 }
 0x29c   :  { %v560_v55 = vpop.eup %559 }
 0x29d   :  { %v193_v56 = vsel %vm186_vm8, %v560_v55, 0.0 }
 0x29e   :  { %194 = vadd.xlane.f32.xlu0 %v193_v56  ;;  %v425_v56 = vld [vmem:[%s869_s8 + $0x30] sm:$0xff] }
 0x29f   :  { %448 = vmatpush.msra.mxu2 %v425_v56 }
 0x2a8   :  { %300 = vrot.lane.b32.xlu2 %v155_v43, %s572_s1  ;;  %v551_v43 = vld [vmem:[%s866_s5] ss:$0 sm:$0xff] }
 0x303   :  { %v278_v57 = vpop.xlane.xlu2 %277 }
 0x304   :  { %v279_v58 = vsub.f32 %v275_v50, %v278_v57  ;;  %v423_v57 = vld [vmem:[%s869_s8 + $0x20] sm:$0xff] }
 0x305   :  { %449 = vmatpush.msra.mxu2 %v423_v57 }
 0x306   :  { %v280_v59 = vmul.f32 1.442695, %v279_v58  ;;  %v422_v58 = vld [vmem:[%s869_s8 + $0x18] sm:$0xff] }
 0x308   :  { %561 = vpow2.f32 %v280_v59  ;;  %v421_v59 = vld [vmem:[%s869_s8 + $0x10] sm:$0xff] }
 0x309   :  { %450 = vmatpush.msra.mxu2 %v421_v59 }
 0x30b   :  { %v301_v60 = vpop.permute.xlu2 %300 }
 0x30c   :  { %541 = vmatpush.msk.msra.mxu1 %vm215_vm7, %v301_v60  ;;  %v420_v60 = vld [vmem:[%s869_s8 + $0x8] sm:$0xff] }
 0x30e   :  { %v706_v61 = vpop.eup %561 }
 0x30f   :  { %v282_v62 = vsel %vm186_vm8, %v706_v61, 0.0 }
 0x310   :  { %283 = vadd.xlane.f32.xlu1 %v282_v62  ;;  %v501_v62 = vld [vmem:[%s870_s10 + $0x78] sm:$0xff] }
 0x311   :  { %v195_v63 = vpop.xlane.xlu0 %194  ;;  %506 = vmatpush.msrb.mxu0 %v501_v62 }
 0x312   :  { %563 = vrcp.f32 %v195_v63  ;;  %v207_v3 = vand.u32 2147483648, %v195_v63  ;;  %v205_v5 = vand.u32 2147483647, %v195_v63  ;;  %vm201_vm10 = vweird.f32 %v195_v63 }
 0x314   :  { %v208_v7 = vor.u32 1.1754944e-38, %v207_v3  ;;  %vm206_vm12 = vcmp.eq.f32.partialorder %v205_v5, 8.507059e+37 }
 0x318   :  { %v564_v0 = vpop.eup %563 }
 0x319   :  { %v197_v1 = vmul.f32 %v564_v0, %v195_v63  ;;  %vm202_vm9 = vweird.f32 %v564_v0  ;;  %v500_v63 = vld [vmem:[%s870_s10 + $0x70] sm:$0xff] }
 0x31a   :  { %vm203_vm11 = vmor %vm201_vm10, %vm202_vm9  ;;  %507 = vmatpush.msrb.mxu0 %v500_v63 }
 0x31b   :  { %v198_v2 = vsub.f32 1.0, %v197_v1 }
 0x31d   :  { %v199_v4 = vmul.f32 %v564_v0, %v198_v2 }
 0x31f   :  { %v200_v6 = vadd.f32 %v564_v0, %v199_v4 }
 0x321   :  { %v204_v9 = vsel %vm203_vm11, %v564_v0, %v200_v6  ;;  %v499_v0 = vld [vmem:[%s870_s10 + $0x68] sm:$0xff] }
 0x322   :  { %v209_v10 = vsel %vm206_vm12, %v208_v7, %v204_v9  ;;  %508 = vmatpush.msrb.mxu0 %v499_v0 }
 0x323   :  { %v210_v11 = vmul.f32 %v560_v55, %v209_v10  ;;  %v426_v55 = vld [vmem:[%s869_s8 + $0x38] sm:$0xff] }
 0x324   :  { %468 = vmatpush.msrb.mxu1 %v426_v55  ;;  %509 = vmatpush.msrb.mxu0 %v498_v16 }
 0x325   :  { %538 = vmatmul.msk.f32.vlgmr.msrb.gmra.mxu3 %vm211_vm13, %v210_v11  ;;  %v552_v11 = vld [vmem:[%s867_s6] ss:$0 sm:$0xff] }
 0x326   :  { %510 = vmatpush.msrb.mxu0 %v497_v17 }
 0x328   :  { %511 = vmatpush.msrb.mxu0 %v496_v18 }
 0x383   :  { %v284_v19 = vpop.xlane.xlu1 %283 }
 0x384   :  { %565 = vrcp.f32 %v284_v19  ;;  %v296_v28 = vand.u32 2147483648, %v284_v19  ;;  %v294_v30 = vand.u32 2147483647, %v284_v19  ;;  %vm290_vm15 = vweird.f32 %v284_v19 }
 0x386   :  { %v297_v34 = vor.u32 1.1754944e-38, %v296_v28  ;;  %vm295_vm2 = vcmp.eq.f32.partialorder %v294_v30, 8.507059e+37  ;;  %v486_v28 = vld [vmem:[%s870_s10] sm:$0xff] }
 0x38a   :  { %v566_v23 = vpop.eup %565 }
 0x38b   :  { %v286_v24 = vmul.f32 %v566_v23, %v284_v19  ;;  %vm291_vm14 = vweird.f32 %v566_v23  ;;  %v495_v19 = vld [vmem:[%s870_s10 + $0x48] sm:$0xff] }
 0x38c   :  { %vm292_vm1 = vmor %vm290_vm15, %vm291_vm14  ;;  %512 = vmatpush.msrb.mxu0 %v495_v19 }
 0x38d   :  { %v287_v26 = vsub.f32 1.0, %v286_v24  ;;  %v490_v24 = vld [vmem:[%s870_s10 + $0x20] sm:$0xff] }
 0x38e   :  { %513 = vmatpush.msrb.mxu0 %v494_v20 }
 0x38f   :  { %v288_v29 = vmul.f32 %v566_v23, %v287_v26  ;;  %v488_v26 = vld [vmem:[%s870_s10 + $0x10] sm:$0xff] }
 0x390   :  { %514 = vmatpush.msrb.mxu0 %v493_v21 }
 0x391   :  { %v289_v32 = vadd.f32 %v566_v23, %v288_v29  ;;  %v427_v29 = vld [vmem:[%s872_s9] sm:$0x3] }
 0x392   :  { %515 = vmatpush.msrb.mxu0 %v492_v22  ;;  %v430_v30 = vperm.slane %v427_v29, 1 }
 0x393   :  { %v293_v35 = vsel %vm292_vm1, %v566_v23, %v289_v32  ;;  %v491_v23 = vld [vmem:[%s870_s10 + $0x28] sm:$0xff] }
 0x394   :  { %v298_v37 = vsel %vm295_vm2, %v297_v34, %v293_v35  ;;  %516 = vmatpush.msrb.mxu0 %v491_v23 }
 0x395   :  { %v299_v38 = vmul.f32 %v706_v61, %v298_v37  ;;  %v419_v61 = vld [vmem:[%s869_s8] sm:$0xff] }
 0x396   :  { %451 = vmatpush.msra.mxu2 %v419_v61  ;;  %517 = vmatpush.msrb.mxu0 %v490_v24 }
 0x397   :  { %542 = vmatmul.msk.f32.vlgmr.msra.gmra.mxu1 %vm211_vm13, %v299_v38  ;;  %v429_v38 = vperm.slane %v427_v29, 0 }
 0x398   :  { %518 = vmatpush.msrb.mxu0 %v489_v25 }
 0x39a   :  { %519 = vmatpush.msrb.mxu0 %v488_v26 }
 0x39c   :  { %520 = vmatpush.msrb.mxu0 %v487_v27 }
 0x39e   :  { %521 = vmatpush.msrb.mxu0 %v486_v28 }
 0x3a8   :  { %v236_v39 = vpop.f32.mrf.mxu3 }
 0x3a9   :  { %544 = vmatmul.msk.f32.vlgmr.msra.gmra.mxu3 %vm158_vm6, %v236_v39 }
 0x414   :  { %v324_v42 = vpop.f32.mrf.mxu1 }
 0x415   :  { %543 = vmatmul.msk.f32.vlgmr.msrb.gmra.mxu2 %vm158_vm6, %v324_v42 }
 0x42c   :  { %v378_v44 = vpop.f32.mrf.mxu3 }
 0x498   :  { %v355_v45 = vpop.f32.mrf.mxu2 }
 0x499   :  { %v379_v46 = vadd.f32 %v378_v44, %v355_v45 }
 0x49b   :  { %v385_v47 = vadd.f32 %v551_v43, %v379_v46 }
 0x49d   :  { %v386_v48 = vadd.f32 %v385_v47, %v689_v40  ;;  %v424_v40 = vld [vmem:[%s869_s8 + $0x28] sm:$0xff]  ;;  %v554_v47 = vld [vmem:[%s871_s11] ss:$0 sm:$0xff] }
 0x49e   :  { %469 = vmatpush.msrb.mxu1 %v424_v40 }
 0x49f   :  { %v389_v49 = vsel %vm44_vm0, %v386_v48, 0.0 }
 0x4a0   :  { %390 = vadd.xlane.f32.xlu0 %v389_v49  ;;  %470 = vmatpush.msrb.mxu1 %v422_v58 }
 0x4a2   :  { %471 = vmatpush.msrb.mxu1 %v420_v60 }
 0x513   :  { %v391_v50 = vpop.xlane.xlu0 %390 }
 0x514   :  { %v392_v51 = vmul.f32 %v391_v50, %v642_v8 }
 0x516   :  { %v393_v52 = vsub.f32 %v386_v48, %v392_v51 }
 0x518   :  { %v394_v53 = vmul.f32 %v393_v52, %v393_v52 }
 0x51a   :  { %v395_v54 = vsel %vm44_vm0, %v394_v53, 0.0 }
 0x51b   :  { %396 = vadd.xlane.f32.xlu0 %v395_v54 }
 0x58e   :  { %v397_v1 = vpop.xlane.xlu0 %396 }
 0x58f   :  { %v398_v2 = vmul.f32 %v397_v1, %v642_v8  ;;  %v553_v8 = vld [vmem:[%s868_s7] ss:$0 sm:$0xff] }
 0x591   :  { %v399_v3 = vadd.f32 1e-05, %v398_v2 }
 0x593   :  { %567 = vrsqrt.f32 %v399_v3  ;;  %vm406_vm4 = vweird.f32 %v399_v3 }
 0x599   :  { %v568_v4 = vpop.eup %567 }
 0x59a   :  { %v401_v5 = vmul.f32 %v568_v4, %v399_v3  ;;  %vm407_vm3 = vweird.f32 %v568_v4 }
 0x59b   :  { %vm408_vm6 = vmor %vm406_vm4, %vm407_vm3 }
 0x59c   :  { %v402_v6 = vmul.f32 %v568_v4, %v401_v5 }
 0x59e   :  { %v403_v7 = vmul.f32 0.5, %v402_v6 }
 0x5a0   :  { %v404_v9 = vsub.f32 1.5, %v403_v7 }
 0x5a2   :  { %v405_v10 = vmul.f32 %v568_v4, %v404_v9 }
 0x5a4   :  { %v409_v12 = vsel %vm408_vm6, %v568_v4, %v405_v10 }
 0x5a5   :  { %v410_v13 = vmul.f32 %v409_v12, %v393_v52 }
 0x5a7   :  { %v414_v14 = vmul.f32 %v552_v11, %v410_v13 }
 0x5a9   :  { %v418_v15 = vadd.f32 %v553_v8, %v414_v14 }
 0x5ab   :  { %545 = vmatmul.msk.f32.vlgmr.msra.gmra.mxu2 %vm94_vm5, %v418_v15  ;;  %546 = vmatmul.msk.f32.vlgmr.msrb.gmra.mxu1 %vm94_vm5, %v418_v15 }
 0x628   :  { %v473_v31 = vpop.f32.mrf.mxu1 }
 0x629   :  { %v474_v32 = vadd.f32 %v473_v31, %v430_v30 }
 0x62b   :  { %v477_v33 = vmul.f32 0.044715, %v474_v32  ;;  %v476_v42 = vmul.f32 0.5, %v474_v32 }
 0x62d   :  { %v478_v34 = vmul.f32 %v477_v33, %v474_v32 }
 0x62e   :  { %v453_v41 = vpop.f32.mrf.mxu2 }
 0x62f   :  { %v479_v35 = vmul.f32 %v478_v34, %v474_v32  ;;  %v454_v44 = vadd.f32 %v453_v41, %v429_v38 }
 0x631   :  { %v480_v36 = vadd.f32 %v479_v35, %v474_v32 }
 0x633   :  { %v481_v37 = vmul.f32 0.7978846, %v480_v36 }
 0x635   :  { %569 = vtanh.f32 %v481_v37 }
 0x63b   :  { %v570_v39 = vpop.eup %569 }
 0x63c   :  { %v483_v43 = vadd.f32 1.0, %v570_v39 }
 0x63e   :  { %v484_v45 = vmul.f32 %v483_v43, %v476_v42 }
 0x640   :  { %v485_v46 = vmul.f32 %v484_v45, %v454_v44 }
 0x642   :  { %522 = vmatmul.f32.vlgmr.msrb.gmra.mxu0 %v485_v46 }
 0x6bf   :  { %v523_v48 = vpop.f32.mrf.mxu0 }
 0x6c0   :  { %v524_v49 = vadd.f32 %v554_v47, %v523_v48 }
 0x6c2   :  { %v526_v50 = vadd.f32 %v524_v49, %v418_v15 }
 0x6c4   :  { %527 = vst.msk [vmem:[%s873_s12] sm:$0x3] %vm44_vm0, %v526_v50 }

</bundles_post_ra>
